<compile_context>
chip_gen: v7x
topology: tpu7x:2x2x1
jax: 0.10.0
libtpu: 0.0.40
codegen_flags: <defaults>
</compile_context>

<pallas_src>
import functools
import math

import jax
import jax.numpy as jnp
from jax import lax
from jax.experimental import pallas as pl
from jax.experimental.pallas import tpu as pltpu


# --------------------------------------------------------------------------------------
# Pallas kernel: one fused (bi)LSTM layer, optionally with the FC head fused in.
#
# Fused gate layout (gate-major, direction-minor), G = 4 * D * H, S = D * H:
#   columns [g*S + d*H : g*S + (d+1)*H]  hold gate g (i,f,g,o) of direction d.
# State h/c is (B, S) = [fwd H | bwd H], so the elementwise cell update is a single
# full-width (B, S) computation with no per-direction slicing.
# --------------------------------------------------------------------------------------
def _lstm_layer_kernel(*refs, T, B, H, D, D_in, head):
    S = D * H          # per-gate width across directions == state width
    G = 4 * S          # fused gate width

    x_parts = refs[:D_in]                         # each (T*B, in_part) f32
    wih_parts = refs[D_in:2 * D_in]               # each (in_part, G)  bf16
    whh_ref, b_ref, h0_ref, c0_ref = refs[2 * D_in:2 * D_in + 4]
    idx = 2 * D_in + 4
    if head:
        fcw_ref, fcb_ref = refs[idx:idx + 2]      # (S, C) f32, (1, C) f32
        idx += 2
        logits_ref = refs[idx]                    # (B, C)
        idx += 1
        out_refs = ()
    else:
        out_refs = refs[idx:idx + D]              # D refs, each (T, B, H)
        idx += D
    gx_scr, h_scr, c_scr = refs[idx:idx + 3]      # (T,B,G), (B,S), (B,S)
    idx += 3
    hb_scr = refs[idx] if (head and D == 2) else None   # (B, H)

    # ---- (1) Input projection for ALL timesteps: one wide MXU matmul per input part,
    #      entirely off the serial recurrence chain.  Bias folded in here once.
    gx = b_ref[...]                                               # (1, G) broadcasts
    for d in range(D_in):
        gx = gx + jnp.dot(x_parts[d][...].astype(jnp.bfloat16), wih_parts[d][...],
                          preferred_element_type=jnp.float32)      # (T*B, G)
    # Distribute the (T*B, G) result into time-major scratch (static, one-time).
    for t in range(T):
        gx_scr[t] = gx[t * B:(t + 1) * B]

    # ---- Hoisted loop invariants (do NOT rebuild broadcasts/masks per iteration).
    whh = whh_ref[...]                                             # (S, G) bf16
    lane = lax.broadcasted_iota(jnp.int32, (B, G), 1)
    g_gate_mask = (lane >= 2 * S) & (lane < 3 * S)                 # tanh lanes (gate "g")
    if D == 2:
        fwd_lane_mask = (lane % S) < H                             # fwd-direction columns

    h_scr[...] = h0_ref[...]
    c_scr[...] = c0_ref[...]
    if hb_scr is not None:
        hb_scr[...] = jnp.zeros_like(hb_scr)

    def step(t, carry):
        h_prev = h_scr[...]                                        # (B, S) f32
        c_prev = c_scr[...]
        # Recurrent projection: ONE (B,S)@(S,G) bf16 MXU matmul covering both directions
        # (W_hh is block-structured so directions stay independent).
        gh = jnp.dot(h_prev.astype(jnp.bfloat16), whh,
                     preferred_element_type=jnp.float32)           # (B, G)
        if D == 2:
            # fwd gates consume x(t), bwd gates consume x(T-1-t): in-kernel time reversal.
            gx_t = jnp.where(fwd_lane_mask, gx_scr[t], gx_scr[T - 1 - t])
        else:
            gx_t = gx_scr[t]
        gates = gh + gx_t
        # Full-width EUP activations + per-lane gate select.
        act = jnp.where(g_gate_mask, jnp.tanh(gates), jax.nn.sigmoid(gates))
        i_g = act[:, 0 * S:1 * S]
        f_g = act[:, 1 * S:2 * S]
        g_g = act[:, 2 * S:3 * S]
        o_g = act[:, 3 * S:4 * S]
        c_new = f_g * c_prev + i_g * g_g                           # (B, S), f32
        h_new = o_g * jnp.tanh(c_new)
        h_scr[...] = h_new
        c_scr[...] = c_new
        if head:
            if D == 2:
                # Only out[:, -1, :] feeds the head.  The backward hidden for original
                # time T-1 is produced at loop step 0 -> capture it; write no sequence.
                hb_scr[...] = jnp.where(t == 0, h_new[:, H:2 * H], hb_scr[...])
        else:
            out_refs[0][t] = h_new[:, 0:H]                         # fwd hidden @ time t
            if D == 2:
                out_refs[1][T - 1 - t] = h_new[:, H:2 * H]         # bwd hidden @ time T-1-t
        return carry

    lax.fori_loop(0, T, step, 0, unroll=True)

    if head:
        # FC head fused into the epilogue: logits = [h_fwd(T-1) | h_bwd(T-1)] @ W_fc + b_fc
        fcw = fcw_ref[...]                                         # (S, C) f32
        h_fin = h_scr[...]
        if D == 2:
            logits = (jnp.dot(h_fin[:, 0:H], fcw[0:H, :],
                              preferred_element_type=jnp.float32)
                      + jnp.dot(hb_scr[...], fcw[H:2 * H, :],
                                preferred_element_type=jnp.float32)
                      + fcb_ref[...])
        else:
            logits = (jnp.dot(h_fin, fcw, preferred_element_type=jnp.float32)
                      + fcb_ref[...])
        logits_ref[...] = logits.astype(logits_ref.dtype)


# --------------------------------------------------------------------------------------
# pallas_call wrapper for one layer
# --------------------------------------------------------------------------------------
def _lstm_layer_call(x_parts, layer_p, h0, c0, *, T, B, H, D, head,
                     fc_w=None, fc_b=None):
    vmem = pl.BlockSpec(memory_space=pltpu.MemorySpace.VMEM)
    G = 4 * D * H
    inputs = (list(x_parts) + list(layer_p["wih_parts"])
              + [layer_p["whh"], layer_p["b"], h0, c0])
    if head:
        C = fc_w.shape[-1]
        inputs += [fc_w, fc_b]
        out_shape = jax.ShapeDtypeStruct((B, C), jnp.float32)
        out_specs = vmem
    else:
        out_shape = tuple(jax.ShapeDtypeStruct((T, B, H), jnp.float32) for _ in range(D))
        out_specs = tuple(vmem for _ in range(D))

    scratch = [pltpu.VMEM((T, B, G), jnp.float32),   # precomputed x-projection
               pltpu.VMEM((B, D * H), jnp.float32),  # running hidden state
               pltpu.VMEM((B, D * H), jnp.float32)]  # running cell state
    if head and D == 2:
        scratch.append(pltpu.VMEM((B, H), jnp.float32))  # bwd hidden at original t = T-1

    kernel = functools.partial(_lstm_layer_kernel, T=T, B=B, H=H, D=D,
                               D_in=len(x_parts), head=head)
    return pl.pallas_call(
        kernel,
        out_shape=out_shape,
        in_specs=[vmem] * len(inputs),
        out_specs=out_specs,
        scratch_shapes=scratch,
    )(*inputs)


# --------------------------------------------------------------------------------------
# Forward pass (replicates LSTM.forward): multi-layer (bi)LSTM + fc(out[:, -1, :]).squeeze(0)
# --------------------------------------------------------------------------------------
def lstm_forward(x, params, h0, c0, *, num_layers, bidirectional):
    D = 2 if bidirectional else 1
    B, T, E = x.shape
    H = h0.shape[-1]

    # batch-first (B,T,E) -> time-major flat (T*B, E).  (At production sizes this transpose
    # would be folded into a time-chunked BlockSpec instead of a wrapper-side HBM pass.)
    x_tm = jnp.transpose(x, (1, 0, 2))
    x_parts = (x_tm.reshape(T * B, E),)

    logits = None
    for layer in range(num_layers):
        p = params["layers"][layer]
        h0_l = jnp.concatenate([h0[layer * D + d] for d in range(D)], axis=-1)  # (B, D*H)
        c0_l = jnp.concatenate([c0[layer * D + d] for d in range(D)], axis=-1)
        head = (layer == num_layers - 1)
        if head:
            logits = _lstm_layer_call(x_parts, p, h0_l, c0_l, T=T, B=B, H=H, D=D,
                                      head=True, fc_w=params["fc_w"], fc_b=params["fc_b"])
        else:
            outs = _lstm_layer_call(x_parts, p, h0_l, c0_l, T=T, B=B, H=H, D=D, head=False)
            # next layer consumes the direction outputs as separate flat parts
            # (free reshapes; no wrapper-side concat / reversal passes).
            x_parts = tuple(o.reshape(T * B, H) for o in outs)

    # torch's .squeeze(0): only squeezes if that dim is size 1
    if logits.shape[0] == 1:
        logits = jnp.squeeze(logits, axis=0)
    return logits


# --------------------------------------------------------------------------------------
# Parameter construction (mirrors nn.LSTM / nn.Linear shapes & init ranges), pre-fused
# into the gate-major / direction-minor layout the kernel expects.  PyTorch gate order
# is (i, f, g, o); biases b_ih + b_hh are summed once here.
# --------------------------------------------------------------------------------------
def init_params(key, embedding_dim, hidden_size, num_classes, num_layers, bidirectional):
    D = 2 if bidirectional else 1
    H = hidden_size
    S = D * H
    G = 4 * S
    k_lstm = 1.0 / math.sqrt(H)
    layers = []
    for layer in range(num_layers):
        in_size = embedding_dim if layer == 0 else D * H
        wih = jnp.zeros((in_size, G), jnp.float32)
        whh = jnp.zeros((S, G), jnp.float32)       # block-structured: directions independent
        b = jnp.zeros((G,), jnp.float32)
        for d in range(D):
            key, k1, k2, k3, k4 = jax.random.split(key, 5)
            # PyTorch layouts: weight_ih (4H, in), weight_hh (4H, H), bias_ih/hh (4H,)
            w_ih = jax.random.uniform(k1, (4 * H, in_size), jnp.float32, -k_lstm, k_lstm)
            w_hh = jax.random.uniform(k2, (4 * H, H), jnp.float32, -k_lstm, k_lstm)
            b_ih = jax.random.uniform(k3, (4 * H,), jnp.float32, -k_lstm, k_lstm)
            b_hh = jax.random.uniform(k4, (4 * H,), jnp.float32, -k_lstm, k_lstm)
            for g in range(4):
                c0_ = g * S + d * H
                wih = wih.at[:, c0_:c0_ + H].set(jnp.transpose(w_ih[g * H:(g + 1) * H, :]))
                whh = whh.at[d * H:(d + 1) * H, c0_:c0_ + H].set(
                    jnp.transpose(w_hh[g * H:(g + 1) * H, :]))
                b = b.at[c0_:c0_ + H].set(b_ih[g * H:(g + 1) * H] + b_hh[g * H:(g + 1) * H])
        if layer == 0:
            wih_parts = (wih.astype(jnp.bfloat16),)
        else:
            # deeper layers take the previous layer's per-direction outputs as separate parts
            wih_parts = tuple(wih[p * H:(p + 1) * H, :].astype(jnp.bfloat16) for p in range(D))
        layers.append({"wih_parts": wih_parts,
                       "whh": whh.astype(jnp.bfloat16),
                       "b": b.reshape(1, G)})

    fc_in = D * H
    k_fc = 1.0 / math.sqrt(fc_in)
    key, k1, k2 = jax.random.split(key, 3)
    fc_w = jax.random.uniform(k1, (num_classes, fc_in), jnp.float32, -k_fc, k_fc)
    fc_b = jax.random.uniform(k2, (num_classes,), jnp.float32, -k_fc, k_fc)
    params = {"layers": layers,
              "fc_w": jnp.transpose(fc_w),          # (fc_in, num_classes)
              "fc_b": fc_b.reshape(1, num_classes)}
    return params, key


# --------------------------------------------------------------------------------------
# Main
# --------------------------------------------------------------------------------------
if __name__ == "__main__":
    embedding_dim = 16
    hidden_size = 32
    num_classes = 4
    batch_size = 2
    seq_len = 8

    key = jax.random.PRNGKey(0)

    # Exercise both the bidirectional and unidirectional paths (2 layers each).
    for num_layers, bidirectional in [(2, True), (2, False)]:
        D = 2 if bidirectional else 1
        params, key = init_params(key, embedding_dim, hidden_size, num_classes,
                                  num_layers, bidirectional)
        key, kx, kh, kc = jax.random.split(key, 4)
        x = jax.random.normal(kx, (batch_size, seq_len, embedding_dim), jnp.float32)
        # forward() draws h0/c0 from randn each call; we use deterministic normals here.
        h0 = jax.random.normal(kh, (num_layers * D, batch_size, hidden_size), jnp.float32)
        c0 = jax.random.normal(kc, (num_layers * D, batch_size, hidden_size), jnp.float32)

        out = lstm_forward(x, params, h0, c0,
                           num_layers=num_layers, bidirectional=bidirectional)
        out = jax.block_until_ready(out)

        assert out.shape == (batch_size, num_classes), out.shape
        assert bool(jnp.all(jnp.isfinite(out)))

    print("KERNEL_OK")
</pallas_src>

<mosaic_0001>
module attributes {stable_mosaic.version = 11 : i64} {
  func.func @_lstm_layer_kernel(%arg0: memref<16x16xf32, #tpu.memory_space<vmem>>, %arg1: memref<16x256xbf16, #tpu.memory_space<vmem>>, %arg2: memref<64x256xbf16, #tpu.memory_space<vmem>>, %arg3: memref<1x256xf32, #tpu.memory_space<vmem>>, %arg4: memref<2x64xf32, #tpu.memory_space<vmem>>, %arg5: memref<2x64xf32, #tpu.memory_space<vmem>>, %arg6: memref<8x2x32xf32, #tpu.memory_space<vmem>>, %arg7: memref<8x2x32xf32, #tpu.memory_space<vmem>>, %arg8: memref<8x2x256xf32, #tpu.memory_space<vmem>>, %arg9: memref<2x64xf32, #tpu.memory_space<vmem>>, %arg10: memref<2x64xf32, #tpu.memory_space<vmem>>) attributes {dimension_semantics = [], scalar_prefetch = 0 : i64, scratch_operands = 3 : i64, tpu.core_type = #tpu.core_type<tc>} {
    %c0 = arith.constant 0 : index
    %c0_0 = arith.constant 0 : index
    %0 = vector.load %arg3[%c0, %c0_0] : memref<1x256xf32, #tpu.memory_space<vmem>>, vector<1x256xf32>
    %c0_1 = arith.constant 0 : index
    %c0_2 = arith.constant 0 : index
    %1 = vector.load %arg0[%c0_1, %c0_2] : memref<16x16xf32, #tpu.memory_space<vmem>>, vector<16x16xf32>
    %2 = arith.truncf %1 : vector<16x16xf32> to vector<16x16xbf16>
    %c0_3 = arith.constant 0 : index
    %c0_4 = arith.constant 0 : index
    %3 = vector.load %arg1[%c0_3, %c0_4] : memref<16x256xbf16, #tpu.memory_space<vmem>>, vector<16x256xbf16>
    %cst = arith.constant dense<0.000000e+00> : vector<16x256xf32>
    %4 = tpu.matmul %2, %3, %cst {dimension_numbers = #tpu.dot_dimension_numbers<[1], [0], [0], [1], [0, 0, 1, 1], [], []>} : vector<16x16xbf16>, vector<16x256xbf16>, vector<16x256xf32> -> vector<16x256xf32>
    %5 = vector.broadcast %0 : vector<1x256xf32> to vector<16x256xf32>
    %6 = arith.addf %5, %4 : vector<16x256xf32>
    %7 = vector.extract_strided_slice %6 {offsets = [0, 0], sizes = [2, 256], strides = [1, 1]} : vector<16x256xf32> to vector<2x256xf32>
    %c0_5 = arith.constant 0 : index
    %c0_6 = arith.constant 0 : index
    %c0_7 = arith.constant 0 : index
    %8 = vector.load %arg8[%c0_5, %c0_6, %c0_7] : memref<8x2x256xf32, #tpu.memory_space<vmem>>, vector<1x2x256xf32>
    %9 = vector.shape_cast %8 : vector<1x2x256xf32> to vector<2x256xf32>
    %10 = vector.shape_cast %7 : vector<2x256xf32> to vector<1x2x256xf32>
    tpu.vector_store %arg8[%c0_5, %c0_6, %c0_7], %10 {strides = array<i32>} : memref<8x2x256xf32, #tpu.memory_space<vmem>>, vector<1x2x256xf32>,
    %11 = vector.extract_strided_slice %6 {offsets = [2, 0], sizes = [2, 256], strides = [1, 1]} : vector<16x256xf32> to vector<2x256xf32>
    %c1 = arith.constant 1 : index
    %c0_8 = arith.constant 0 : index
    %c0_9 = arith.constant 0 : index
    %12 = vector.load %arg8[%c1, %c0_8, %c0_9] : memref<8x2x256xf32, #tpu.memory_space<vmem>>, vector<1x2x256xf32>
    %13 = vector.shape_cast %12 : vector<1x2x256xf32> to vector<2x256xf32>
    %14 = vector.shape_cast %11 : vector<2x256xf32> to vector<1x2x256xf32>
    tpu.vector_store %arg8[%c1, %c0_8, %c0_9], %14 {strides = array<i32>} : memref<8x2x256xf32, #tpu.memory_space<vmem>>, vector<1x2x256xf32>,
    %15 = vector.extract_strided_slice %6 {offsets = [4, 0], sizes = [2, 256], strides = [1, 1]} : vector<16x256xf32> to vector<2x256xf32>
    %c2 = arith.constant 2 : index
    %c0_10 = arith.constant 0 : index
    %c0_11 = arith.constant 0 : index
    %16 = vector.load %arg8[%c2, %c0_10, %c0_11] : memref<8x2x256xf32, #tpu.memory_space<vmem>>, vector<1x2x256xf32>
    %17 = vector.shape_cast %16 : vector<1x2x256xf32> to vector<2x256xf32>
    %18 = vector.shape_cast %15 : vector<2x256xf32> to vector<1x2x256xf32>
    tpu.vector_store %arg8[%c2, %c0_10, %c0_11], %18 {strides = array<i32>} : memref<8x2x256xf32, #tpu.memory_space<vmem>>, vector<1x2x256xf32>,
    %19 = vector.extract_strided_slice %6 {offsets = [6, 0], sizes = [2, 256], strides = [1, 1]} : vector<16x256xf32> to vector<2x256xf32>
    %c3 = arith.constant 3 : index
    %c0_12 = arith.constant 0 : index
    %c0_13 = arith.constant 0 : index
    %20 = vector.load %arg8[%c3, %c0_12, %c0_13] : memref<8x2x256xf32, #tpu.memory_space<vmem>>, vector<1x2x256xf32>
    %21 = vector.shape_cast %20 : vector<1x2x256xf32> to vector<2x256xf32>
    %22 = vector.shape_cast %19 : vector<2x256xf32> to vector<1x2x256xf32>
    tpu.vector_store %arg8[%c3, %c0_12, %c0_13], %22 {strides = array<i32>} : memref<8x2x256xf32, #tpu.memory_space<vmem>>, vector<1x2x256xf32>,
    %23 = vector.extract_strided_slice %6 {offsets = [8, 0], sizes = [2, 256], strides = [1, 1]} : vector<16x256xf32> to vector<2x256xf32>
    %c4 = arith.constant 4 : index
    %c0_14 = arith.constant 0 : index
    %c0_15 = arith.constant 0 : index
    %24 = vector.load %arg8[%c4, %c0_14, %c0_15] : memref<8x2x256xf32, #tpu.memory_space<vmem>>, vector<1x2x256xf32>
    %25 = vector.shape_cast %24 : vector<1x2x256xf32> to vector<2x256xf32>
    %26 = vector.shape_cast %23 : vector<2x256xf32> to vector<1x2x256xf32>
    tpu.vector_store %arg8[%c4, %c0_14, %c0_15], %26 {strides = array<i32>} : memref<8x2x256xf32, #tpu.memory_space<vmem>>, vector<1x2x256xf32>,
    %27 = vector.extract_strided_slice %6 {offsets = [10, 0], sizes = [2, 256], strides = [1, 1]} : vector<16x256xf32> to vector<2x256xf32>
    %c5 = arith.constant 5 : index
    %c0_16 = arith.constant 0 : index
    %c0_17 = arith.constant 0 : index
    %28 = vector.load %arg8[%c5, %c0_16, %c0_17] : memref<8x2x256xf32, #tpu.memory_space<vmem>>, vector<1x2x256xf32>
    %29 = vector.shape_cast %28 : vector<1x2x256xf32> to vector<2x256xf32>
    %30 = vector.shape_cast %27 : vector<2x256xf32> to vector<1x2x256xf32>
    tpu.vector_store %arg8[%c5, %c0_16, %c0_17], %30 {strides = array<i32>} : memref<8x2x256xf32, #tpu.memory_space<vmem>>, vector<1x2x256xf32>,
    %31 = vector.extract_strided_slice %6 {offsets = [12, 0], sizes = [2, 256], strides = [1, 1]} : vector<16x256xf32> to vector<2x256xf32>
    %c6 = arith.constant 6 : index
    %c0_18 = arith.constant 0 : index
    %c0_19 = arith.constant 0 : index
    %32 = vector.load %arg8[%c6, %c0_18, %c0_19] : memref<8x2x256xf32, #tpu.memory_space<vmem>>, vector<1x2x256xf32>
    %33 = vector.shape_cast %32 : vector<1x2x256xf32> to vector<2x256xf32>
    %34 = vector.shape_cast %31 : vector<2x256xf32> to vector<1x2x256xf32>
    tpu.vector_store %arg8[%c6, %c0_18, %c0_19], %34 {strides = array<i32>} : memref<8x2x256xf32, #tpu.memory_space<vmem>>, vector<1x2x256xf32>,
    %35 = vector.extract_strided_slice %6 {offsets = [14, 0], sizes = [2, 256], strides = [1, 1]} : vector<16x256xf32> to vector<2x256xf32>
    %c7 = arith.constant 7 : index
    %c0_20 = arith.constant 0 : index
    %c0_21 = arith.constant 0 : index
    %36 = vector.load %arg8[%c7, %c0_20, %c0_21] : memref<8x2x256xf32, #tpu.memory_space<vmem>>, vector<1x2x256xf32>
    %37 = vector.shape_cast %36 : vector<1x2x256xf32> to vector<2x256xf32>
    %38 = vector.shape_cast %35 : vector<2x256xf32> to vector<1x2x256xf32>
    tpu.vector_store %arg8[%c7, %c0_20, %c0_21], %38 {strides = array<i32>} : memref<8x2x256xf32, #tpu.memory_space<vmem>>, vector<1x2x256xf32>,
    %c0_22 = arith.constant 0 : index
    %c0_23 = arith.constant 0 : index
    %39 = vector.load %arg2[%c0_22, %c0_23] : memref<64x256xbf16, #tpu.memory_space<vmem>>, vector<64x256xbf16>
    %40 = tpu.iota {dimensions = array<i32: 1>} : vector<2x256xi32>
    %c128_i32 = arith.constant 128 : i32
    %41 = vector.broadcast %c128_i32 : i32 to vector<2x256xi32>
    %42 = arith.cmpi sge, %40, %41 : vector<2x256xi32>
    %c192_i32 = arith.constant 192 : i32
    %43 = vector.broadcast %c192_i32 : i32 to vector<2x256xi32>
    %44 = arith.cmpi slt, %40, %43 : vector<2x256xi32>
    %45 = arith.andi %42, %44 : vector<2x256xi1>
    %c64_i32 = arith.constant 64 : i32
    %c0_i32 = arith.constant 0 : i32
    %46 = arith.cmpi eq, %c64_i32, %c0_i32 : i32
    %c1_i32 = arith.constant 1 : i32
    %47 = arith.select %46, %c1_i32, %c64_i32 : i32
    %48 = vector.broadcast %47 : i32 to vector<2x256xi32>
    %49 = arith.remsi %40, %48 : vector<2x256xi32>
    %c0_i32_24 = arith.constant 0 : i32
    %50 = vector.broadcast %c0_i32_24 : i32 to vector<2x256xi32>
    %51 = arith.cmpi ne, %49, %50 : vector<2x256xi32>
    %c0_i32_25 = arith.constant 0 : i32
    %52 = vector.broadcast %c0_i32_25 : i32 to vector<2x256xi32>
    %53 = arith.cmpi slt, %49, %52 : vector<2x256xi32>
    %c0_i32_26 = arith.constant 0 : i32
    %54 = arith.cmpi slt, %47, %c0_i32_26 : i32
    %55 = vector.broadcast %54 : i1 to vector<2x256xi1>
    %56 = vector.broadcast %55 : vector<2x256xi1> to vector<2x256xi1>
    %57 = arith.xori %53, %56 : vector<2x256xi1>
    %58 = arith.andi %57, %51 : vector<2x256xi1>
    %59 = vector.broadcast %47 : i32 to vector<2x256xi32>
    %60 = arith.addi %49, %59 : vector<2x256xi32>
    %61 = arith.select %58, %60, %49 : vector<2x256xi1>, vector<2x256xi32>
    %c32_i32 = arith.constant 32 : i32
    %62 = vector.broadcast %c32_i32 : i32 to vector<2x256xi32>
    %63 = arith.cmpi slt, %61, %62 : vector<2x256xi32>
    %c0_27 = arith.constant 0 : index
    %c0_28 = arith.constant 0 : index
    %64 = vector.load %arg4[%c0_27, %c0_28] : memref<2x64xf32, #tpu.memory_space<vmem>>, vector<2x64xf32>
    %c0_29 = arith.constant 0 : index
    %c0_30 = arith.constant 0 : index
    %65 = vector.load %arg9[%c0_29, %c0_30] : memref<2x64xf32, #tpu.memory_space<vmem>>, vector<2x64xf32>
    tpu.vector_store %arg9[%c0_29, %c0_30], %64 {strides = array<i32>} : memref<2x64xf32, #tpu.memory_space<vmem>>, vector<2x64xf32>,
    %c0_31 = arith.constant 0 : index
    %c0_32 = arith.constant 0 : index
    %66 = vector.load %arg5[%c0_31, %c0_32] : memref<2x64xf32, #tpu.memory_space<vmem>>, vector<2x64xf32>
    %c0_33 = arith.constant 0 : index
    %c0_34 = arith.constant 0 : index
    %67 = vector.load %arg10[%c0_33, %c0_34] : memref<2x64xf32, #tpu.memory_space<vmem>>, vector<2x64xf32>
    tpu.vector_store %arg10[%c0_33, %c0_34], %66 {strides = array<i32>} : memref<2x64xf32, #tpu.memory_space<vmem>>, vector<2x64xf32>,
    %c0_i32_35 = arith.constant 0 : i32
    %c0_36 = arith.constant 0 : index
    %c0_37 = arith.constant 0 : index
    %68 = vector.load %arg9[%c0_36, %c0_37] : memref<2x64xf32, #tpu.memory_space<vmem>>, vector<2x64xf32>
    %c0_38 = arith.constant 0 : index
    %c0_39 = arith.constant 0 : index
    %69 = vector.load %arg10[%c0_38, %c0_39] : memref<2x64xf32, #tpu.memory_space<vmem>>, vector<2x64xf32>
    %70 = arith.truncf %68 : vector<2x64xf32> to vector<2x64xbf16>
    %cst_40 = arith.constant dense<0.000000e+00> : vector<2x256xf32>
    %71 = tpu.matmul %70, %39, %cst_40 {dimension_numbers = #tpu.dot_dimension_numbers<[1], [0], [0], [1], [0, 0, 1, 1], [], []>} : vector<2x64xbf16>, vector<64x256xbf16>, vector<2x256xf32> -> vector<2x256xf32>
    %72 = arith.index_cast %c0_i32_35 : i32 to index
    %c0_41 = arith.constant 0 : index
    %c0_42 = arith.constant 0 : index
    %73 = vector.load %arg8[%72, %c0_41, %c0_42] : memref<8x2x256xf32, #tpu.memory_space<vmem>>, vector<1x2x256xf32>
    %74 = vector.shape_cast %73 : vector<1x2x256xf32> to vector<2x256xf32>
    %c7_i32 = arith.constant 7 : i32
    %75 = arith.subi %c7_i32, %c0_i32_35 : i32
    %76 = arith.index_cast %75 : i32 to index
    %c0_43 = arith.constant 0 : index
    %c0_44 = arith.constant 0 : index
    %77 = vector.load %arg8[%76, %c0_43, %c0_44] : memref<8x2x256xf32, #tpu.memory_space<vmem>>, vector<1x2x256xf32>
    %78 = vector.shape_cast %77 : vector<1x2x256xf32> to vector<2x256xf32>
    %79 = arith.select %63, %74, %78 : vector<2x256xi1>, vector<2x256xf32>
    %80 = arith.addf %71, %79 : vector<2x256xf32>
    %81 = math.tanh %80 : vector<2x256xf32>
    %82 = arith.negf %80 : vector<2x256xf32>
    %83 = math.exp %82 : vector<2x256xf32>
    %cst_45 = arith.constant 1.000000e+00 : f32
    %84 = vector.broadcast %cst_45 : f32 to vector<2x256xf32>
    %85 = arith.addf %84, %83 : vector<2x256xf32>
    %86 = arith.divf %84, %85 : vector<2x256xf32>
    %87 = arith.select %45, %81, %86 : vector<2x256xi1>, vector<2x256xf32>
    %88 = vector.extract_strided_slice %87 {offsets = [0, 0], sizes = [2, 64], strides = [1, 1]} : vector<2x256xf32> to vector<2x64xf32>
    %89 = vector.extract_strided_slice %87 {offsets = [0, 64], sizes = [2, 64], strides = [1, 1]} : vector<2x256xf32> to vector<2x64xf32>
    %90 = vector.extract_strided_slice %87 {offsets = [0, 128], sizes = [2, 64], strides = [1, 1]} : vector<2x256xf32> to vector<2x64xf32>
    %91 = vector.extract_strided_slice %87 {offsets = [0, 192], sizes = [2, 64], strides = [1, 1]} : vector<2x256xf32> to vector<2x64xf32>
    %92 = arith.mulf %89, %69 : vector<2x64xf32>
    %93 = arith.mulf %88, %90 : vector<2x64xf32>
    %94 = arith.addf %92, %93 : vector<2x64xf32>
    %95 = math.tanh %94 : vector<2x64xf32>
    %96 = arith.mulf %91, %95 : vector<2x64xf32>
    %c0_46 = arith.constant 0 : index
    %c0_47 = arith.constant 0 : index
    %97 = vector.load %arg9[%c0_46, %c0_47] : memref<2x64xf32, #tpu.memory_space<vmem>>, vector<2x64xf32>
    tpu.vector_store %arg9[%c0_46, %c0_47], %96 {strides = array<i32>} : memref<2x64xf32, #tpu.memory_space<vmem>>, vector<2x64xf32>,
    %c0_48 = arith.constant 0 : index
    %c0_49 = arith.constant 0 : index
    %98 = vector.load %arg10[%c0_48, %c0_49] : memref<2x64xf32, #tpu.memory_space<vmem>>, vector<2x64xf32>
    tpu.vector_store %arg10[%c0_48, %c0_49], %94 {strides = array<i32>} : memref<2x64xf32, #tpu.memory_space<vmem>>, vector<2x64xf32>,
    %99 = vector.extract_strided_slice %96 {offsets = [0, 0], sizes = [2, 32], strides = [1, 1]} : vector<2x64xf32> to vector<2x32xf32>
    %100 = arith.index_cast %c0_i32_35 : i32 to index
    %c0_50 = arith.constant 0 : index
    %c0_51 = arith.constant 0 : index
    %101 = vector.load %arg6[%100, %c0_50, %c0_51] : memref<8x2x32xf32, #tpu.memory_space<vmem>>, vector<1x2x32xf32>
    %102 = vector.shape_cast %101 : vector<1x2x32xf32> to vector<2x32xf32>
    %103 = vector.shape_cast %99 : vector<2x32xf32> to vector<1x2x32xf32>
    tpu.vector_store %arg6[%100, %c0_50, %c0_51], %103 {strides = array<i32>} : memref<8x2x32xf32, #tpu.memory_space<vmem>>, vector<1x2x32xf32>,
    %104 = vector.extract_strided_slice %96 {offsets = [0, 32], sizes = [2, 32], strides = [1, 1]} : vector<2x64xf32> to vector<2x32xf32>
    %c7_i32_52 = arith.constant 7 : i32
    %105 = arith.subi %c7_i32_52, %c0_i32_35 : i32
    %106 = arith.index_cast %105 : i32 to index
    %c0_53 = arith.constant 0 : index
    %c0_54 = arith.constant 0 : index
    %107 = vector.load %arg7[%106, %c0_53, %c0_54] : memref<8x2x32xf32, #tpu.memory_space<vmem>>, vector<1x2x32xf32>
    %108 = vector.shape_cast %107 : vector<1x2x32xf32> to vector<2x32xf32>
    %109 = vector.shape_cast %104 : vector<2x32xf32> to vector<1x2x32xf32>
    tpu.vector_store %arg7[%106, %c0_53, %c0_54], %109 {strides = array<i32>} : memref<8x2x32xf32, #tpu.memory_space<vmem>>, vector<1x2x32xf32>,
    %c1_i32_55 = arith.constant 1 : i32
    %c0_56 = arith.constant 0 : index
    %c0_57 = arith.constant 0 : index
    %110 = vector.load %arg9[%c0_56, %c0_57] : memref<2x64xf32, #tpu.memory_space<vmem>>, vector<2x64xf32>
    %c0_58 = arith.constant 0 : index
    %c0_59 = arith.constant 0 : index
    %111 = vector.load %arg10[%c0_58, %c0_59] : memref<2x64xf32, #tpu.memory_space<vmem>>, vector<2x64xf32>
    %112 = arith.truncf %110 : vector<2x64xf32> to vector<2x64xbf16>
    %cst_60 = arith.constant dense<0.000000e+00> : vector<2x256xf32>
    %113 = tpu.matmul %112, %39, %cst_60 {dimension_numbers = #tpu.dot_dimension_numbers<[1], [0], [0], [1], [0, 0, 1, 1], [], []>} : vector<2x64xbf16>, vector<64x256xbf16>, vector<2x256xf32> -> vector<2x256xf32>
    %114 = arith.index_cast %c1_i32_55 : i32 to index
    %c0_61 = arith.constant 0 : index
    %c0_62 = arith.constant 0 : index
    %115 = vector.load %arg8[%114, %c0_61, %c0_62] : memref<8x2x256xf32, #tpu.memory_space<vmem>>, vector<1x2x256xf32>
    %116 = vector.shape_cast %115 : vector<1x2x256xf32> to vector<2x256xf32>
    %c7_i32_63 = arith.constant 7 : i32
    %117 = arith.subi %c7_i32_63, %c1_i32_55 : i32
    %118 = arith.index_cast %117 : i32 to index
    %c0_64 = arith.constant 0 : index
    %c0_65 = arith.constant 0 : index
    %119 = vector.load %arg8[%118, %c0_64, %c0_65] : memref<8x2x256xf32, #tpu.memory_space<vmem>>, vector<1x2x256xf32>
    %120 = vector.shape_cast %119 : vector<1x2x256xf32> to vector<2x256xf32>
    %121 = arith.select %63, %116, %120 : vector<2x256xi1>, vector<2x256xf32>
    %122 = arith.addf %113, %121 : vector<2x256xf32>
    %123 = math.tanh %122 : vector<2x256xf32>
    %124 = arith.negf %122 : vector<2x256xf32>
    %125 = math.exp %124 : vector<2x256xf32>
    %cst_66 = arith.constant 1.000000e+00 : f32
    %126 = vector.broadcast %cst_66 : f32 to vector<2x256xf32>
    %127 = arith.addf %126, %125 : vector<2x256xf32>
    %128 = arith.divf %126, %127 : vector<2x256xf32>
    %129 = arith.select %45, %123, %128 : vector<2x256xi1>, vector<2x256xf32>
    %130 = vector.extract_strided_slice %129 {offsets = [0, 0], sizes = [2, 64], strides = [1, 1]} : vector<2x256xf32> to vector<2x64xf32>
    %131 = vector.extract_strided_slice %129 {offsets = [0, 64], sizes = [2, 64], strides = [1, 1]} : vector<2x256xf32> to vector<2x64xf32>
    %132 = vector.extract_strided_slice %129 {offsets = [0, 128], sizes = [2, 64], strides = [1, 1]} : vector<2x256xf32> to vector<2x64xf32>
    %133 = vector.extract_strided_slice %129 {offsets = [0, 192], sizes = [2, 64], strides = [1, 1]} : vector<2x256xf32> to vector<2x64xf32>
    %134 = arith.mulf %131, %111 : vector<2x64xf32>
    %135 = arith.mulf %130, %132 : vector<2x64xf32>
    %136 = arith.addf %134, %135 : vector<2x64xf32>
    %137 = math.tanh %136 : vector<2x64xf32>
    %138 = arith.mulf %133, %137 : vector<2x64xf32>
    %c0_67 = arith.constant 0 : index
    %c0_68 = arith.constant 0 : index
    %139 = vector.load %arg9[%c0_67, %c0_68] : memref<2x64xf32, #tpu.memory_space<vmem>>, vector<2x64xf32>
    tpu.vector_store %arg9[%c0_67, %c0_68], %138 {strides = array<i32>} : memref<2x64xf32, #tpu.memory_space<vmem>>, vector<2x64xf32>,
    %c0_69 = arith.constant 0 : index
    %c0_70 = arith.constant 0 : index
    %140 = vector.load %arg10[%c0_69, %c0_70] : memref<2x64xf32, #tpu.memory_space<vmem>>, vector<2x64xf32>
    tpu.vector_store %arg10[%c0_69, %c0_70], %136 {strides = array<i32>} : memref<2x64xf32, #tpu.memory_space<vmem>>, vector<2x64xf32>,
    %141 = vector.extract_strided_slice %138 {offsets = [0, 0], sizes = [2, 32], strides = [1, 1]} : vector<2x64xf32> to vector<2x32xf32>
    %142 = arith.index_cast %c1_i32_55 : i32 to index
    %c0_71 = arith.constant 0 : index
    %c0_72 = arith.constant 0 : index
    %143 = vector.load %arg6[%142, %c0_71, %c0_72] : memref<8x2x32xf32, #tpu.memory_space<vmem>>, vector<1x2x32xf32>
    %144 = vector.shape_cast %143 : vector<1x2x32xf32> to vector<2x32xf32>
    %145 = vector.shape_cast %141 : vector<2x32xf32> to vector<1x2x32xf32>
    tpu.vector_store %arg6[%142, %c0_71, %c0_72], %145 {strides = array<i32>} : memref<8x2x32xf32, #tpu.memory_space<vmem>>, vector<1x2x32xf32>,
    %146 = vector.extract_strided_slice %138 {offsets = [0, 32], sizes = [2, 32], strides = [1, 1]} : vector<2x64xf32> to vector<2x32xf32>
    %c7_i32_73 = arith.constant 7 : i32
    %147 = arith.subi %c7_i32_73, %c1_i32_55 : i32
    %148 = arith.index_cast %147 : i32 to index
    %c0_74 = arith.constant 0 : index
    %c0_75 = arith.constant 0 : index
    %149 = vector.load %arg7[%148, %c0_74, %c0_75] : memref<8x2x32xf32, #tpu.memory_space<vmem>>, vector<1x2x32xf32>
    %150 = vector.shape_cast %149 : vector<1x2x32xf32> to vector<2x32xf32>
    %151 = vector.shape_cast %146 : vector<2x32xf32> to vector<1x2x32xf32>
    tpu.vector_store %arg7[%148, %c0_74, %c0_75], %151 {strides = array<i32>} : memref<8x2x32xf32, #tpu.memory_space<vmem>>, vector<1x2x32xf32>,
    %c2_i32 = arith.constant 2 : i32
    %c0_76 = arith.constant 0 : index
    %c0_77 = arith.constant 0 : index
    %152 = vector.load %arg9[%c0_76, %c0_77] : memref<2x64xf32, #tpu.memory_space<vmem>>, vector<2x64xf32>
    %c0_78 = arith.constant 0 : index
    %c0_79 = arith.constant 0 : index
    %153 = vector.load %arg10[%c0_78, %c0_79] : memref<2x64xf32, #tpu.memory_space<vmem>>, vector<2x64xf32>
    %154 = arith.truncf %152 : vector<2x64xf32> to vector<2x64xbf16>
    %cst_80 = arith.constant dense<0.000000e+00> : vector<2x256xf32>
    %155 = tpu.matmul %154, %39, %cst_80 {dimension_numbers = #tpu.dot_dimension_numbers<[1], [0], [0], [1], [0, 0, 1, 1], [], []>} : vector<2x64xbf16>, vector<64x256xbf16>, vector<2x256xf32> -> vector<2x256xf32>
    %156 = arith.index_cast %c2_i32 : i32 to index
    %c0_81 = arith.constant 0 : index
    %c0_82 = arith.constant 0 : index
    %157 = vector.load %arg8[%156, %c0_81, %c0_82] : memref<8x2x256xf32, #tpu.memory_space<vmem>>, vector<1x2x256xf32>
    %158 = vector.shape_cast %157 : vector<1x2x256xf32> to vector<2x256xf32>
    %c7_i32_83 = arith.constant 7 : i32
    %159 = arith.subi %c7_i32_83, %c2_i32 : i32
    %160 = arith.index_cast %159 : i32 to index
    %c0_84 = arith.constant 0 : index
    %c0_85 = arith.constant 0 : index
    %161 = vector.load %arg8[%160, %c0_84, %c0_85] : memref<8x2x256xf32, #tpu.memory_space<vmem>>, vector<1x2x256xf32>
    %162 = vector.shape_cast %161 : vector<1x2x256xf32> to vector<2x256xf32>
    %163 = arith.select %63, %158, %162 : vector<2x256xi1>, vector<2x256xf32>
    %164 = arith.addf %155, %163 : vector<2x256xf32>
    %165 = math.tanh %164 : vector<2x256xf32>
    %166 = arith.negf %164 : vector<2x256xf32>
    %167 = math.exp %166 : vector<2x256xf32>
    %cst_86 = arith.constant 1.000000e+00 : f32
    %168 = vector.broadcast %cst_86 : f32 to vector<2x256xf32>
    %169 = arith.addf %168, %167 : vector<2x256xf32>
    %170 = arith.divf %168, %169 : vector<2x256xf32>
    %171 = arith.select %45, %165, %170 : vector<2x256xi1>, vector<2x256xf32>
    %172 = vector.extract_strided_slice %171 {offsets = [0, 0], sizes = [2, 64], strides = [1, 1]} : vector<2x256xf32> to vector<2x64xf32>
    %173 = vector.extract_strided_slice %171 {offsets = [0, 64], sizes = [2, 64], strides = [1, 1]} : vector<2x256xf32> to vector<2x64xf32>
    %174 = vector.extract_strided_slice %171 {offsets = [0, 128], sizes = [2, 64], strides = [1, 1]} : vector<2x256xf32> to vector<2x64xf32>
    %175 = vector.extract_strided_slice %171 {offsets = [0, 192], sizes = [2, 64], strides = [1, 1]} : vector<2x256xf32> to vector<2x64xf32>
    %176 = arith.mulf %173, %153 : vector<2x64xf32>
    %177 = arith.mulf %172, %174 : vector<2x64xf32>
    %178 = arith.addf %176, %177 : vector<2x64xf32>
    %179 = math.tanh %178 : vector<2x64xf32>
    %180 = arith.mulf %175, %179 : vector<2x64xf32>
    %c0_87 = arith.constant 0 : index
    %c0_88 = arith.constant 0 : index
    %181 = vector.load %arg9[%c0_87, %c0_88] : memref<2x64xf32, #tpu.memory_space<vmem>>, vector<2x64xf32>
    tpu.vector_store %arg9[%c0_87, %c0_88], %180 {strides = array<i32>} : memref<2x64xf32, #tpu.memory_space<vmem>>, vector<2x64xf32>,
    %c0_89 = arith.constant 0 : index
    %c0_90 = arith.constant 0 : index
    %182 = vector.load %arg10[%c0_89, %c0_90] : memref<2x64xf32, #tpu.memory_space<vmem>>, vector<2x64xf32>
    tpu.vector_store %arg10[%c0_89, %c0_90], %178 {strides = array<i32>} : memref<2x64xf32, #tpu.memory_space<vmem>>, vector<2x64xf32>,
    %183 = vector.extract_strided_slice %180 {offsets = [0, 0], sizes = [2, 32], strides = [1, 1]} : vector<2x64xf32> to vector<2x32xf32>
    %184 = arith.index_cast %c2_i32 : i32 to index
    %c0_91 = arith.constant 0 : index
    %c0_92 = arith.constant 0 : index
    %185 = vector.load %arg6[%184, %c0_91, %c0_92] : memref<8x2x32xf32, #tpu.memory_space<vmem>>, vector<1x2x32xf32>
    %186 = vector.shape_cast %185 : vector<1x2x32xf32> to vector<2x32xf32>
    %187 = vector.shape_cast %183 : vector<2x32xf32> to vector<1x2x32xf32>
    tpu.vector_store %arg6[%184, %c0_91, %c0_92], %187 {strides = array<i32>} : memref<8x2x32xf32, #tpu.memory_space<vmem>>, vector<1x2x32xf32>,
    %188 = vector.extract_strided_slice %180 {offsets = [0, 32], sizes = [2, 32], strides = [1, 1]} : vector<2x64xf32> to vector<2x32xf32>
    %c7_i32_93 = arith.constant 7 : i32
    %189 = arith.subi %c7_i32_93, %c2_i32 : i32
    %190 = arith.index_cast %189 : i32 to index
    %c0_94 = arith.constant 0 : index
    %c0_95 = arith.constant 0 : index
    %191 = vector.load %arg7[%190, %c0_94, %c0_95] : memref<8x2x32xf32, #tpu.memory_space<vmem>>, vector<1x2x32xf32>
    %192 = vector.shape_cast %191 : vector<1x2x32xf32> to vector<2x32xf32>
    %193 = vector.shape_cast %188 : vector<2x32xf32> to vector<1x2x32xf32>
    tpu.vector_store %arg7[%190, %c0_94, %c0_95], %193 {strides = array<i32>} : memref<8x2x32xf32, #tpu.memory_space<vmem>>, vector<1x2x32xf32>,
    %c3_i32 = arith.constant 3 : i32
    %c0_96 = arith.constant 0 : index
    %c0_97 = arith.constant 0 : index
    %194 = vector.load %arg9[%c0_96, %c0_97] : memref<2x64xf32, #tpu.memory_space<vmem>>, vector<2x64xf32>
    %c0_98 = arith.constant 0 : index
    %c0_99 = arith.constant 0 : index
    %195 = vector.load %arg10[%c0_98, %c0_99] : memref<2x64xf32, #tpu.memory_space<vmem>>, vector<2x64xf32>
    %196 = arith.truncf %194 : vector<2x64xf32> to vector<2x64xbf16>
    %cst_100 = arith.constant dense<0.000000e+00> : vector<2x256xf32>
    %197 = tpu.matmul %196, %39, %cst_100 {dimension_numbers = #tpu.dot_dimension_numbers<[1], [0], [0], [1], [0, 0, 1, 1], [], []>} : vector<2x64xbf16>, vector<64x256xbf16>, vector<2x256xf32> -> vector<2x256xf32>
    %198 = arith.index_cast %c3_i32 : i32 to index
    %c0_101 = arith.constant 0 : index
    %c0_102 = arith.constant 0 : index
    %199 = vector.load %arg8[%198, %c0_101, %c0_102] : memref<8x2x256xf32, #tpu.memory_space<vmem>>, vector<1x2x256xf32>
    %200 = vector.shape_cast %199 : vector<1x2x256xf32> to vector<2x256xf32>
    %c7_i32_103 = arith.constant 7 : i32
    %201 = arith.subi %c7_i32_103, %c3_i32 : i32
    %202 = arith.index_cast %201 : i32 to index
    %c0_104 = arith.constant 0 : index
    %c0_105 = arith.constant 0 : index
    %203 = vector.load %arg8[%202, %c0_104, %c0_105] : memref<8x2x256xf32, #tpu.memory_space<vmem>>, vector<1x2x256xf32>
    %204 = vector.shape_cast %203 : vector<1x2x256xf32> to vector<2x256xf32>
    %205 = arith.select %63, %200, %204 : vector<2x256xi1>, vector<2x256xf32>
    %206 = arith.addf %197, %205 : vector<2x256xf32>
    %207 = math.tanh %206 : vector<2x256xf32>
    %208 = arith.negf %206 : vector<2x256xf32>
    %209 = math.exp %208 : vector<2x256xf32>
    %cst_106 = arith.constant 1.000000e+00 : f32
    %210 = vector.broadcast %cst_106 : f32 to vector<2x256xf32>
    %211 = arith.addf %210, %209 : vector<2x256xf32>
    %212 = arith.divf %210, %211 : vector<2x256xf32>
    %213 = arith.select %45, %207, %212 : vector<2x256xi1>, vector<2x256xf32>
    %214 = vector.extract_strided_slice %213 {offsets = [0, 0], sizes = [2, 64], strides = [1, 1]} : vector<2x256xf32> to vector<2x64xf32>
    %215 = vector.extract_strided_slice %213 {offsets = [0, 64], sizes = [2, 64], strides = [1, 1]} : vector<2x256xf32> to vector<2x64xf32>
    %216 = vector.extract_strided_slice %213 {offsets = [0, 128], sizes = [2, 64], strides = [1, 1]} : vector<2x256xf32> to vector<2x64xf32>
    %217 = vector.extract_strided_slice %213 {offsets = [0, 192], sizes = [2, 64], strides = [1, 1]} : vector<2x256xf32> to vector<2x64xf32>
    %218 = arith.mulf %215, %195 : vector<2x64xf32>
    %219 = arith.mulf %214, %216 : vector<2x64xf32>
    %220 = arith.addf %218, %219 : vector<2x64xf32>
    %221 = math.tanh %220 : vector<2x64xf32>
    %222 = arith.mulf %217, %221 : vector<2x64xf32>
    %c0_107 = arith.constant 0 : index
    %c0_108 = arith.constant 0 : index
    %223 = vector.load %arg9[%c0_107, %c0_108] : memref<2x64xf32, #tpu.memory_space<vmem>>, vector<2x64xf32>
    tpu.vector_store %arg9[%c0_107, %c0_108], %222 {strides = array<i32>} : memref<2x64xf32, #tpu.memory_space<vmem>>, vector<2x64xf32>,
    %c0_109 = arith.constant 0 : index
    %c0_110 = arith.constant 0 : index
    %224 = vector.load %arg10[%c0_109, %c0_110] : memref<2x64xf32, #tpu.memory_space<vmem>>, vector<2x64xf32>
    tpu.vector_store %arg10[%c0_109, %c0_110], %220 {strides = array<i32>} : memref<2x64xf32, #tpu.memory_space<vmem>>, vector<2x64xf32>,
    %225 = vector.extract_strided_slice %222 {offsets = [0, 0], sizes = [2, 32], strides = [1, 1]} : vector<2x64xf32> to vector<2x32xf32>
    %226 = arith.index_cast %c3_i32 : i32 to index
    %c0_111 = arith.constant 0 : index
    %c0_112 = arith.constant 0 : index
    %227 = vector.load %arg6[%226, %c0_111, %c0_112] : memref<8x2x32xf32, #tpu.memory_space<vmem>>, vector<1x2x32xf32>
    %228 = vector.shape_cast %227 : vector<1x2x32xf32> to vector<2x32xf32>
    %229 = vector.shape_cast %225 : vector<2x32xf32> to vector<1x2x32xf32>
    tpu.vector_store %arg6[%226, %c0_111, %c0_112], %229 {strides = array<i32>} : memref<8x2x32xf32, #tpu.memory_space<vmem>>, vector<1x2x32xf32>,
    %230 = vector.extract_strided_slice %222 {offsets = [0, 32], sizes = [2, 32], strides = [1, 1]} : vector<2x64xf32> to vector<2x32xf32>
    %c7_i32_113 = arith.constant 7 : i32
    %231 = arith.subi %c7_i32_113, %c3_i32 : i32
    %232 = arith.index_cast %231 : i32 to index
    %c0_114 = arith.constant 0 : index
    %c0_115 = arith.constant 0 : index
    %233 = vector.load %arg7[%232, %c0_114, %c0_115] : memref<8x2x32xf32, #tpu.memory_space<vmem>>, vector<1x2x32xf32>
    %234 = vector.shape_cast %233 : vector<1x2x32xf32> to vector<2x32xf32>
    %235 = vector.shape_cast %230 : vector<2x32xf32> to vector<1x2x32xf32>
    tpu.vector_store %arg7[%232, %c0_114, %c0_115], %235 {strides = array<i32>} : memref<8x2x32xf32, #tpu.memory_space<vmem>>, vector<1x2x32xf32>,
    %c4_i32 = arith.constant 4 : i32
    %c0_116 = arith.constant 0 : index
    %c0_117 = arith.constant 0 : index
    %236 = vector.load %arg9[%c0_116, %c0_117] : memref<2x64xf32, #tpu.memory_space<vmem>>, vector<2x64xf32>
    %c0_118 = arith.constant 0 : index
    %c0_119 = arith.constant 0 : index
    %237 = vector.load %arg10[%c0_118, %c0_119] : memref<2x64xf32, #tpu.memory_space<vmem>>, vector<2x64xf32>
    %238 = arith.truncf %236 : vector<2x64xf32> to vector<2x64xbf16>
    %cst_120 = arith.constant dense<0.000000e+00> : vector<2x256xf32>
    %239 = tpu.matmul %238, %39, %cst_120 {dimension_numbers = #tpu.dot_dimension_numbers<[1], [0], [0], [1], [0, 0, 1, 1], [], []>} : vector<2x64xbf16>, vector<64x256xbf16>, vector<2x256xf32> -> vector<2x256xf32>
    %240 = arith.index_cast %c4_i32 : i32 to index
    %c0_121 = arith.constant 0 : index
    %c0_122 = arith.constant 0 : index
    %241 = vector.load %arg8[%240, %c0_121, %c0_122] : memref<8x2x256xf32, #tpu.memory_space<vmem>>, vector<1x2x256xf32>
    %242 = vector.shape_cast %241 : vector<1x2x256xf32> to vector<2x256xf32>
    %c7_i32_123 = arith.constant 7 : i32
    %243 = arith.subi %c7_i32_123, %c4_i32 : i32
    %244 = arith.index_cast %243 : i32 to index
    %c0_124 = arith.constant 0 : index
    %c0_125 = arith.constant 0 : index
    %245 = vector.load %arg8[%244, %c0_124, %c0_125] : memref<8x2x256xf32, #tpu.memory_space<vmem>>, vector<1x2x256xf32>
    %246 = vector.shape_cast %245 : vector<1x2x256xf32> to vector<2x256xf32>
    %247 = arith.select %63, %242, %246 : vector<2x256xi1>, vector<2x256xf32>
    %248 = arith.addf %239, %247 : vector<2x256xf32>
    %249 = math.tanh %248 : vector<2x256xf32>
    %250 = arith.negf %248 : vector<2x256xf32>
    %251 = math.exp %250 : vector<2x256xf32>
    %cst_126 = arith.constant 1.000000e+00 : f32
    %252 = vector.broadcast %cst_126 : f32 to vector<2x256xf32>
    %253 = arith.addf %252, %251 : vector<2x256xf32>
    %254 = arith.divf %252, %253 : vector<2x256xf32>
    %255 = arith.select %45, %249, %254 : vector<2x256xi1>, vector<2x256xf32>
    %256 = vector.extract_strided_slice %255 {offsets = [0, 0], sizes = [2, 64], strides = [1, 1]} : vector<2x256xf32> to vector<2x64xf32>
    %257 = vector.extract_strided_slice %255 {offsets = [0, 64], sizes = [2, 64], strides = [1, 1]} : vector<2x256xf32> to vector<2x64xf32>
    %258 = vector.extract_strided_slice %255 {offsets = [0, 128], sizes = [2, 64], strides = [1, 1]} : vector<2x256xf32> to vector<2x64xf32>
    %259 = vector.extract_strided_slice %255 {offsets = [0, 192], sizes = [2, 64], strides = [1, 1]} : vector<2x256xf32> to vector<2x64xf32>
    %260 = arith.mulf %257, %237 : vector<2x64xf32>
    %261 = arith.mulf %256, %258 : vector<2x64xf32>
    %262 = arith.addf %260, %261 : vector<2x64xf32>
    %263 = math.tanh %262 : vector<2x64xf32>
    %264 = arith.mulf %259, %263 : vector<2x64xf32>
    %c0_127 = arith.constant 0 : index
    %c0_128 = arith.constant 0 : index
    %265 = vector.load %arg9[%c0_127, %c0_128] : memref<2x64xf32, #tpu.memory_space<vmem>>, vector<2x64xf32>
    tpu.vector_store %arg9[%c0_127, %c0_128], %264 {strides = array<i32>} : memref<2x64xf32, #tpu.memory_space<vmem>>, vector<2x64xf32>,
    %c0_129 = arith.constant 0 : index
    %c0_130 = arith.constant 0 : index
    %266 = vector.load %arg10[%c0_129, %c0_130] : memref<2x64xf32, #tpu.memory_space<vmem>>, vector<2x64xf32>
    tpu.vector_store %arg10[%c0_129, %c0_130], %262 {strides = array<i32>} : memref<2x64xf32, #tpu.memory_space<vmem>>, vector<2x64xf32>,
    %267 = vector.extract_strided_slice %264 {offsets = [0, 0], sizes = [2, 32], strides = [1, 1]} : vector<2x64xf32> to vector<2x32xf32>
    %268 = arith.index_cast %c4_i32 : i32 to index
    %c0_131 = arith.constant 0 : index
    %c0_132 = arith.constant 0 : index
    %269 = vector.load %arg6[%268, %c0_131, %c0_132] : memref<8x2x32xf32, #tpu.memory_space<vmem>>, vector<1x2x32xf32>
    %270 = vector.shape_cast %269 : vector<1x2x32xf32> to vector<2x32xf32>
    %271 = vector.shape_cast %267 : vector<2x32xf32> to vector<1x2x32xf32>
    tpu.vector_store %arg6[%268, %c0_131, %c0_132], %271 {strides = array<i32>} : memref<8x2x32xf32, #tpu.memory_space<vmem>>, vector<1x2x32xf32>,
    %272 = vector.extract_strided_slice %264 {offsets = [0, 32], sizes = [2, 32], strides = [1, 1]} : vector<2x64xf32> to vector<2x32xf32>
    %c7_i32_133 = arith.constant 7 : i32
    %273 = arith.subi %c7_i32_133, %c4_i32 : i32
    %274 = arith.index_cast %273 : i32 to index
    %c0_134 = arith.constant 0 : index
    %c0_135 = arith.constant 0 : index
    %275 = vector.load %arg7[%274, %c0_134, %c0_135] : memref<8x2x32xf32, #tpu.memory_space<vmem>>, vector<1x2x32xf32>
    %276 = vector.shape_cast %275 : vector<1x2x32xf32> to vector<2x32xf32>
    %277 = vector.shape_cast %272 : vector<2x32xf32> to vector<1x2x32xf32>
    tpu.vector_store %arg7[%274, %c0_134, %c0_135], %277 {strides = array<i32>} : memref<8x2x32xf32, #tpu.memory_space<vmem>>, vector<1x2x32xf32>,
    %c5_i32 = arith.constant 5 : i32
    %c0_136 = arith.constant 0 : index
    %c0_137 = arith.constant 0 : index
    %278 = vector.load %arg9[%c0_136, %c0_137] : memref<2x64xf32, #tpu.memory_space<vmem>>, vector<2x64xf32>
    %c0_138 = arith.constant 0 : index
    %c0_139 = arith.constant 0 : index
    %279 = vector.load %arg10[%c0_138, %c0_139] : memref<2x64xf32, #tpu.memory_space<vmem>>, vector<2x64xf32>
    %280 = arith.truncf %278 : vector<2x64xf32> to vector<2x64xbf16>
    %cst_140 = arith.constant dense<0.000000e+00> : vector<2x256xf32>
    %281 = tpu.matmul %280, %39, %cst_140 {dimension_numbers = #tpu.dot_dimension_numbers<[1], [0], [0], [1], [0, 0, 1, 1], [], []>} : vector<2x64xbf16>, vector<64x256xbf16>, vector<2x256xf32> -> vector<2x256xf32>
    %282 = arith.index_cast %c5_i32 : i32 to index
    %c0_141 = arith.constant 0 : index
    %c0_142 = arith.constant 0 : index
    %283 = vector.load %arg8[%282, %c0_141, %c0_142] : memref<8x2x256xf32, #tpu.memory_space<vmem>>, vector<1x2x256xf32>
    %284 = vector.shape_cast %283 : vector<1x2x256xf32> to vector<2x256xf32>
    %c7_i32_143 = arith.constant 7 : i32
    %285 = arith.subi %c7_i32_143, %c5_i32 : i32
    %286 = arith.index_cast %285 : i32 to index
    %c0_144 = arith.constant 0 : index
    %c0_145 = arith.constant 0 : index
    %287 = vector.load %arg8[%286, %c0_144, %c0_145] : memref<8x2x256xf32, #tpu.memory_space<vmem>>, vector<1x2x256xf32>
    %288 = vector.shape_cast %287 : vector<1x2x256xf32> to vector<2x256xf32>
    %289 = arith.select %63, %284, %288 : vector<2x256xi1>, vector<2x256xf32>
    %290 = arith.addf %281, %289 : vector<2x256xf32>
    %291 = math.tanh %290 : vector<2x256xf32>
    %292 = arith.negf %290 : vector<2x256xf32>
    %293 = math.exp %292 : vector<2x256xf32>
    %cst_146 = arith.constant 1.000000e+00 : f32
    %294 = vector.broadcast %cst_146 : f32 to vector<2x256xf32>
    %295 = arith.addf %294, %293 : vector<2x256xf32>
    %296 = arith.divf %294, %295 : vector<2x256xf32>
    %297 = arith.select %45, %291, %296 : vector<2x256xi1>, vector<2x256xf32>
    %298 = vector.extract_strided_slice %297 {offsets = [0, 0], sizes = [2, 64], strides = [1, 1]} : vector<2x256xf32> to vector<2x64xf32>
    %299 = vector.extract_strided_slice %297 {offsets = [0, 64], sizes = [2, 64], strides = [1, 1]} : vector<2x256xf32> to vector<2x64xf32>
    %300 = vector.extract_strided_slice %297 {offsets = [0, 128], sizes = [2, 64], strides = [1, 1]} : vector<2x256xf32> to vector<2x64xf32>
    %301 = vector.extract_strided_slice %297 {offsets = [0, 192], sizes = [2, 64], strides = [1, 1]} : vector<2x256xf32> to vector<2x64xf32>
    %302 = arith.mulf %299, %279 : vector<2x64xf32>
    %303 = arith.mulf %298, %300 : vector<2x64xf32>
    %304 = arith.addf %302, %303 : vector<2x64xf32>
    %305 = math.tanh %304 : vector<2x64xf32>
    %306 = arith.mulf %301, %305 : vector<2x64xf32>
    %c0_147 = arith.constant 0 : index
    %c0_148 = arith.constant 0 : index
    %307 = vector.load %arg9[%c0_147, %c0_148] : memref<2x64xf32, #tpu.memory_space<vmem>>, vector<2x64xf32>
    tpu.vector_store %arg9[%c0_147, %c0_148], %306 {strides = array<i32>} : memref<2x64xf32, #tpu.memory_space<vmem>>, vector<2x64xf32>,
    %c0_149 = arith.constant 0 : index
    %c0_150 = arith.constant 0 : index
    %308 = vector.load %arg10[%c0_149, %c0_150] : memref<2x64xf32, #tpu.memory_space<vmem>>, vector<2x64xf32>
    tpu.vector_store %arg10[%c0_149, %c0_150], %304 {strides = array<i32>} : memref<2x64xf32, #tpu.memory_space<vmem>>, vector<2x64xf32>,
    %309 = vector.extract_strided_slice %306 {offsets = [0, 0], sizes = [2, 32], strides = [1, 1]} : vector<2x64xf32> to vector<2x32xf32>
    %310 = arith.index_cast %c5_i32 : i32 to index
    %c0_151 = arith.constant 0 : index
    %c0_152 = arith.constant 0 : index
    %311 = vector.load %arg6[%310, %c0_151, %c0_152] : memref<8x2x32xf32, #tpu.memory_space<vmem>>, vector<1x2x32xf32>
    %312 = vector.shape_cast %311 : vector<1x2x32xf32> to vector<2x32xf32>
    %313 = vector.shape_cast %309 : vector<2x32xf32> to vector<1x2x32xf32>
    tpu.vector_store %arg6[%310, %c0_151, %c0_152], %313 {strides = array<i32>} : memref<8x2x32xf32, #tpu.memory_space<vmem>>, vector<1x2x32xf32>,
    %314 = vector.extract_strided_slice %306 {offsets = [0, 32], sizes = [2, 32], strides = [1, 1]} : vector<2x64xf32> to vector<2x32xf32>
    %c7_i32_153 = arith.constant 7 : i32
    %315 = arith.subi %c7_i32_153, %c5_i32 : i32
    %316 = arith.index_cast %315 : i32 to index
    %c0_154 = arith.constant 0 : index
    %c0_155 = arith.constant 0 : index
    %317 = vector.load %arg7[%316, %c0_154, %c0_155] : memref<8x2x32xf32, #tpu.memory_space<vmem>>, vector<1x2x32xf32>
    %318 = vector.shape_cast %317 : vector<1x2x32xf32> to vector<2x32xf32>
    %319 = vector.shape_cast %314 : vector<2x32xf32> to vector<1x2x32xf32>
    tpu.vector_store %arg7[%316, %c0_154, %c0_155], %319 {strides = array<i32>} : memref<8x2x32xf32, #tpu.memory_space<vmem>>, vector<1x2x32xf32>,
    %c6_i32 = arith.constant 6 : i32
    %c0_156 = arith.constant 0 : index
    %c0_157 = arith.constant 0 : index
    %320 = vector.load %arg9[%c0_156, %c0_157] : memref<2x64xf32, #tpu.memory_space<vmem>>, vector<2x64xf32>
    %c0_158 = arith.constant 0 : index
    %c0_159 = arith.constant 0 : index
    %321 = vector.load %arg10[%c0_158, %c0_159] : memref<2x64xf32, #tpu.memory_space<vmem>>, vector<2x64xf32>
    %322 = arith.truncf %320 : vector<2x64xf32> to vector<2x64xbf16>
    %cst_160 = arith.constant dense<0.000000e+00> : vector<2x256xf32>
    %323 = tpu.matmul %322, %39, %cst_160 {dimension_numbers = #tpu.dot_dimension_numbers<[1], [0], [0], [1], [0, 0, 1, 1], [], []>} : vector<2x64xbf16>, vector<64x256xbf16>, vector<2x256xf32> -> vector<2x256xf32>
    %324 = arith.index_cast %c6_i32 : i32 to index
    %c0_161 = arith.constant 0 : index
    %c0_162 = arith.constant 0 : index
    %325 = vector.load %arg8[%324, %c0_161, %c0_162] : memref<8x2x256xf32, #tpu.memory_space<vmem>>, vector<1x2x256xf32>
    %326 = vector.shape_cast %325 : vector<1x2x256xf32> to vector<2x256xf32>
    %c7_i32_163 = arith.constant 7 : i32
    %327 = arith.subi %c7_i32_163, %c6_i32 : i32
    %328 = arith.index_cast %327 : i32 to index
    %c0_164 = arith.constant 0 : index
    %c0_165 = arith.constant 0 : index
    %329 = vector.load %arg8[%328, %c0_164, %c0_165] : memref<8x2x256xf32, #tpu.memory_space<vmem>>, vector<1x2x256xf32>
    %330 = vector.shape_cast %329 : vector<1x2x256xf32> to vector<2x256xf32>
    %331 = arith.select %63, %326, %330 : vector<2x256xi1>, vector<2x256xf32>
    %332 = arith.addf %323, %331 : vector<2x256xf32>
    %333 = math.tanh %332 : vector<2x256xf32>
    %334 = arith.negf %332 : vector<2x256xf32>
    %335 = math.exp %334 : vector<2x256xf32>
    %cst_166 = arith.constant 1.000000e+00 : f32
    %336 = vector.broadcast %cst_166 : f32 to vector<2x256xf32>
    %337 = arith.addf %336, %335 : vector<2x256xf32>
    %338 = arith.divf %336, %337 : vector<2x256xf32>
    %339 = arith.select %45, %333, %338 : vector<2x256xi1>, vector<2x256xf32>
    %340 = vector.extract_strided_slice %339 {offsets = [0, 0], sizes = [2, 64], strides = [1, 1]} : vector<2x256xf32> to vector<2x64xf32>
    %341 = vector.extract_strided_slice %339 {offsets = [0, 64], sizes = [2, 64], strides = [1, 1]} : vector<2x256xf32> to vector<2x64xf32>
    %342 = vector.extract_strided_slice %339 {offsets = [0, 128], sizes = [2, 64], strides = [1, 1]} : vector<2x256xf32> to vector<2x64xf32>
    %343 = vector.extract_strided_slice %339 {offsets = [0, 192], sizes = [2, 64], strides = [1, 1]} : vector<2x256xf32> to vector<2x64xf32>
    %344 = arith.mulf %341, %321 : vector<2x64xf32>
    %345 = arith.mulf %340, %342 : vector<2x64xf32>
    %346 = arith.addf %344, %345 : vector<2x64xf32>
    %347 = math.tanh %346 : vector<2x64xf32>
    %348 = arith.mulf %343, %347 : vector<2x64xf32>
    %c0_167 = arith.constant 0 : index
    %c0_168 = arith.constant 0 : index
    %349 = vector.load %arg9[%c0_167, %c0_168] : memref<2x64xf32, #tpu.memory_space<vmem>>, vector<2x64xf32>
    tpu.vector_store %arg9[%c0_167, %c0_168], %348 {strides = array<i32>} : memref<2x64xf32, #tpu.memory_space<vmem>>, vector<2x64xf32>,
    %c0_169 = arith.constant 0 : index
    %c0_170 = arith.constant 0 : index
    %350 = vector.load %arg10[%c0_169, %c0_170] : memref<2x64xf32, #tpu.memory_space<vmem>>, vector<2x64xf32>
    tpu.vector_store %arg10[%c0_169, %c0_170], %346 {strides = array<i32>} : memref<2x64xf32, #tpu.memory_space<vmem>>, vector<2x64xf32>,
    %351 = vector.extract_strided_slice %348 {offsets = [0, 0], sizes = [2, 32], strides = [1, 1]} : vector<2x64xf32> to vector<2x32xf32>
    %352 = arith.index_cast %c6_i32 : i32 to index
    %c0_171 = arith.constant 0 : index
    %c0_172 = arith.constant 0 : index
    %353 = vector.load %arg6[%352, %c0_171, %c0_172] : memref<8x2x32xf32, #tpu.memory_space<vmem>>, vector<1x2x32xf32>
    %354 = vector.shape_cast %353 : vector<1x2x32xf32> to vector<2x32xf32>
    %355 = vector.shape_cast %351 : vector<2x32xf32> to vector<1x2x32xf32>
    tpu.vector_store %arg6[%352, %c0_171, %c0_172], %355 {strides = array<i32>} : memref<8x2x32xf32, #tpu.memory_space<vmem>>, vector<1x2x32xf32>,
    %356 = vector.extract_strided_slice %348 {offsets = [0, 32], sizes = [2, 32], strides = [1, 1]} : vector<2x64xf32> to vector<2x32xf32>
    %c7_i32_173 = arith.constant 7 : i32
    %357 = arith.subi %c7_i32_173, %c6_i32 : i32
    %358 = arith.index_cast %357 : i32 to index
    %c0_174 = arith.constant 0 : index
    %c0_175 = arith.constant 0 : index
    %359 = vector.load %arg7[%358, %c0_174, %c0_175] : memref<8x2x32xf32, #tpu.memory_space<vmem>>, vector<1x2x32xf32>
    %360 = vector.shape_cast %359 : vector<1x2x32xf32> to vector<2x32xf32>
    %361 = vector.shape_cast %356 : vector<2x32xf32> to vector<1x2x32xf32>
    tpu.vector_store %arg7[%358, %c0_174, %c0_175], %361 {strides = array<i32>} : memref<8x2x32xf32, #tpu.memory_space<vmem>>, vector<1x2x32xf32>,
    %c7_i32_176 = arith.constant 7 : i32
    %c0_177 = arith.constant 0 : index
    %c0_178 = arith.constant 0 : index
    %362 = vector.load %arg9[%c0_177, %c0_178] : memref<2x64xf32, #tpu.memory_space<vmem>>, vector<2x64xf32>
    %c0_179 = arith.constant 0 : index
    %c0_180 = arith.constant 0 : index
    %363 = vector.load %arg10[%c0_179, %c0_180] : memref<2x64xf32, #tpu.memory_space<vmem>>, vector<2x64xf32>
    %364 = arith.truncf %362 : vector<2x64xf32> to vector<2x64xbf16>
    %cst_181 = arith.constant dense<0.000000e+00> : vector<2x256xf32>
    %365 = tpu.matmul %364, %39, %cst_181 {dimension_numbers = #tpu.dot_dimension_numbers<[1], [0], [0], [1], [0, 0, 1, 1], [], []>} : vector<2x64xbf16>, vector<64x256xbf16>, vector<2x256xf32> -> vector<2x256xf32>
    %366 = arith.index_cast %c7_i32_176 : i32 to index
    %c0_182 = arith.constant 0 : index
    %c0_183 = arith.constant 0 : index
    %367 = vector.load %arg8[%366, %c0_182, %c0_183] : memref<8x2x256xf32, #tpu.memory_space<vmem>>, vector<1x2x256xf32>
    %368 = vector.shape_cast %367 : vector<1x2x256xf32> to vector<2x256xf32>
    %c7_i32_184 = arith.constant 7 : i32
    %369 = arith.subi %c7_i32_184, %c7_i32_176 : i32
    %370 = arith.index_cast %369 : i32 to index
    %c0_185 = arith.constant 0 : index
    %c0_186 = arith.constant 0 : index
    %371 = vector.load %arg8[%370, %c0_185, %c0_186] : memref<8x2x256xf32, #tpu.memory_space<vmem>>, vector<1x2x256xf32>
    %372 = vector.shape_cast %371 : vector<1x2x256xf32> to vector<2x256xf32>
    %373 = arith.select %63, %368, %372 : vector<2x256xi1>, vector<2x256xf32>
    %374 = arith.addf %365, %373 : vector<2x256xf32>
    %375 = math.tanh %374 : vector<2x256xf32>
    %376 = arith.negf %374 : vector<2x256xf32>
    %377 = math.exp %376 : vector<2x256xf32>
    %cst_187 = arith.constant 1.000000e+00 : f32
    %378 = vector.broadcast %cst_187 : f32 to vector<2x256xf32>
    %379 = arith.addf %378, %377 : vector<2x256xf32>
    %380 = arith.divf %378, %379 : vector<2x256xf32>
    %381 = arith.select %45, %375, %380 : vector<2x256xi1>, vector<2x256xf32>
    %382 = vector.extract_strided_slice %381 {offsets = [0, 0], sizes = [2, 64], strides = [1, 1]} : vector<2x256xf32> to vector<2x64xf32>
    %383 = vector.extract_strided_slice %381 {offsets = [0, 64], sizes = [2, 64], strides = [1, 1]} : vector<2x256xf32> to vector<2x64xf32>
    %384 = vector.extract_strided_slice %381 {offsets = [0, 128], sizes = [2, 64], strides = [1, 1]} : vector<2x256xf32> to vector<2x64xf32>
    %385 = vector.extract_strided_slice %381 {offsets = [0, 192], sizes = [2, 64], strides = [1, 1]} : vector<2x256xf32> to vector<2x64xf32>
    %386 = arith.mulf %383, %363 : vector<2x64xf32>
    %387 = arith.mulf %382, %384 : vector<2x64xf32>
    %388 = arith.addf %386, %387 : vector<2x64xf32>
    %389 = math.tanh %388 : vector<2x64xf32>
    %390 = arith.mulf %385, %389 : vector<2x64xf32>
    %c0_188 = arith.constant 0 : index
    %c0_189 = arith.constant 0 : index
    %391 = vector.load %arg9[%c0_188, %c0_189] : memref<2x64xf32, #tpu.memory_space<vmem>>, vector<2x64xf32>
    tpu.vector_store %arg9[%c0_188, %c0_189], %390 {strides = array<i32>} : memref<2x64xf32, #tpu.memory_space<vmem>>, vector<2x64xf32>,
    %c0_190 = arith.constant 0 : index
    %c0_191 = arith.constant 0 : index
    %392 = vector.load %arg10[%c0_190, %c0_191] : memref<2x64xf32, #tpu.memory_space<vmem>>, vector<2x64xf32>
    tpu.vector_store %arg10[%c0_190, %c0_191], %388 {strides = array<i32>} : memref<2x64xf32, #tpu.memory_space<vmem>>, vector<2x64xf32>,
    %393 = vector.extract_strided_slice %390 {offsets = [0, 0], sizes = [2, 32], strides = [1, 1]} : vector<2x64xf32> to vector<2x32xf32>
    %394 = arith.index_cast %c7_i32_176 : i32 to index
    %c0_192 = arith.constant 0 : index
    %c0_193 = arith.constant 0 : index
    %395 = vector.load %arg6[%394, %c0_192, %c0_193] : memref<8x2x32xf32, #tpu.memory_space<vmem>>, vector<1x2x32xf32>
    %396 = vector.shape_cast %395 : vector<1x2x32xf32> to vector<2x32xf32>
    %397 = vector.shape_cast %393 : vector<2x32xf32> to vector<1x2x32xf32>
    tpu.vector_store %arg6[%394, %c0_192, %c0_193], %397 {strides = array<i32>} : memref<8x2x32xf32, #tpu.memory_space<vmem>>, vector<1x2x32xf32>,
    %398 = vector.extract_strided_slice %390 {offsets = [0, 32], sizes = [2, 32], strides = [1, 1]} : vector<2x64xf32> to vector<2x32xf32>
    %c7_i32_194 = arith.constant 7 : i32
    %399 = arith.subi %c7_i32_194, %c7_i32_176 : i32
    %400 = arith.index_cast %399 : i32 to index
    %c0_195 = arith.constant 0 : index
    %c0_196 = arith.constant 0 : index
    %401 = vector.load %arg7[%400, %c0_195, %c0_196] : memref<8x2x32xf32, #tpu.memory_space<vmem>>, vector<1x2x32xf32>
    %402 = vector.shape_cast %401 : vector<1x2x32xf32> to vector<2x32xf32>
    %403 = vector.shape_cast %398 : vector<2x32xf32> to vector<1x2x32xf32>
    tpu.vector_store %arg7[%400, %c0_195, %c0_196], %403 {strides = array<i32>} : memref<8x2x32xf32, #tpu.memory_space<vmem>>, vector<1x2x32xf32>,
    %c8_i32 = arith.constant 8 : i32
    return
  }
}

</mosaic_0001>

<bundles_post_ra>
// kernel: tpu_custom_call.1
= control target key start
LH: loop header
LB: loop body
LE: loop exit
PB: predicated region body
PF: predicated region fallthrough
CT: control target
= control target key end

     0   :  { %13 = vsyncpa [#allocation6], 0  ;;  %s2103_s0 = inlined_call_operand.hbm [shape: f32[16,16], index: 0, kind: input, shape index: {}]   ;;  %s2104_s1 = inlined_call_operand.hbm [shape: bf16[16,256], index: 1, kind: input, shape index: {}]   ;;  %s2105_s2 = inlined_call_operand.hbm [shape: bf16[64,256], index: 2, kind: input, shape index: {}]   ;;  %s2106_s3 = inlined_call_operand.vmem [shape: f32[1,256], index: 3, kind: input, shape index: {}]   ;;  %s2107_s4 = inlined_call_operand.vmem [shape: f32[2,64], index: 4, kind: input, shape index: {}]   ;;  %s2108_s5 = inlined_call_operand.vmem [shape: f32[2,64], index: 5, kind: input, shape index: {}]   ;;  %s2109_s6 = inlined_call_operand.hbm [shape: f32[8,2,32], index: 6, kind: output, shape index: {0}]   ;;  %s2110_s7 = inlined_call_operand.hbm [shape: f32[8,2,32], index: 7, kind: output, shape index: {1}]  }
   0x1   :  { %14 = vsyncpa [#allocation9], 0 }
   0x2   :  { %15 = vsyncpa [#allocation7], 0 }
   0x3   :  { %16 = vsyncpa [#allocation13], 0  ;;  %s1580_s24 = smov [#allocation8]   ;;  %s1581_s26 = smov [#allocation5]  }
   0x4   :  { %s34_s25 = sshll.u32 %s1580_s24, 4  ;;  %s22_s27 = sshll.u32 %s1581_s26, 4  ;;  %s35_s25 = int_to_ptr.vmem [resolvable:$true] %s34_s25  ;;  %s1632_s27 = int_to_ptr.vmem [resolvable:$true] %s22_s27 }
   0x5   :  { %s1462_s30 = scalar_lea.hbm %s2104_s1, 256 }
   0x6   :  { %p1463_p0 = scmp.ne.s32.totalorder %s2104_s1, %s1462_s30  ;;  %p1466_p1 = scmp.lt.u32.totalorder %s1462_s30, %s2104_s1 }
   0x8   :  { %p1468_p2 = pnand %p1466_p1, %p1463_p0 }
   0xa   :  { %1471 = shalt.err (!%p1468_p2)
}
   0xb   :  { %s1472_s12 = scalar_lea.vmem %s35_s25, 256  ;;  %p1477_p4 = scmp.lt.s32.totalorder %s35_s25, %s35_s25 }
   0xc   :  { %p1473_p3 = scmp.ne.s32.totalorder %s35_s25, %s1472_s12  ;;  %p1478_p5 = scmp.lt.s32.totalorder %s1472_s12, %s1472_s12 }
   0xe   :  { %p1479_p6 = por %p1478_p5, %p1477_p4 }
  0x10   :  { %p1480_p7 = pnand %p1479_p6, %p1473_p3 }
  0x12   :  { %1483 = shalt.err (!%p1480_p7)
}
  0x13   :  { %s1582_s13 = smov 128   ;;  %s1583_s14 = smov 8  }
  0x14   :  { %40 = dma.hbm_to_vmem [thread:$0]  %s2104_s1, 256, %s35_s25, [#allocation9], %s1582_s13, %s1582_s13, %s1583_s14  }
  0x15   :  { %s1484_s19 = scalar_lea.hbm %s2103_s0, 256 }
  0x16   :  { %p1485_p8 = scmp.ne.s32.totalorder %s2103_s0, %s1484_s19  ;;  %p1488_p9 = scmp.lt.u32.totalorder %s1484_s19, %s2103_s0 }
  0x18   :  { %p1490_p10 = pnand %p1488_p9, %p1485_p8 }
  0x1a   :  { %1493 = shalt.err (!%p1490_p10)
}
  0x1b   :  { %s1494_s24 = scalar_lea.vmem %s1632_s27, 256  ;;  %p1499_p12 = scmp.lt.s32.totalorder %s1632_s27, %s1632_s27 }
  0x1c   :  { %p1495_p11 = scmp.ne.s32.totalorder %s1632_s27, %s1494_s24  ;;  %p1500_p13 = scmp.lt.s32.totalorder %s1494_s24, %s1494_s24 }
  0x1e   :  { %p1501_p0 = por %p1500_p13, %p1499_p12 }
  0x20   :  { %p1502_p1 = pnand %p1501_p0, %p1495_p11 }
  0x22   :  { %1505 = shalt.err (!%p1502_p1)
}
  0x23   :  { %28 = dma.hbm_to_vmem [thread:$0]  %s2103_s0, 256, %s1632_s27, [#allocation6], %s1582_s13, %s1582_s13, %s1583_s14  }
  0x24   :  { %s1584_s26 = smov [#allocation10]   ;;  %s1506_s8 = scalar_lea.hbm %s2105_s2, 1024 }
  0x25   :  { %s46_s28 = sshll.u32 %s1584_s26, 4  ;;  %p1507_p2 = scmp.ne.s32.totalorder %s2105_s2, %s1506_s8  ;;  %s47_s28 = int_to_ptr.vmem [resolvable:$true] %s46_s28 }
  0x26   :  { %p1510_p3 = scmp.lt.u32.totalorder %s1506_s8, %s2105_s2 }
  0x28   :  { %p1512_p4 = pnand %p1510_p3, %p1507_p2 }
  0x2a   :  { %1515 = shalt.err (!%p1512_p4)
}
  0x2b   :  { %s1516_s15 = scalar_lea.vmem %s47_s28, 1024  ;;  %p1521_p6 = scmp.lt.s32.totalorder %s47_s28, %s47_s28 }
  0x2c   :  { %p1517_p5 = scmp.ne.s32.totalorder %s47_s28, %s1516_s15  ;;  %p1522_p7 = scmp.lt.s32.totalorder %s1516_s15, %s1516_s15 }
  0x2e   :  { %p1523_p8 = por %p1522_p7, %p1521_p6 }
  0x30   :  { %p1524_p9 = pnand %p1523_p8, %p1517_p5 }
  0x32   :  { %1527 = shalt.err (!%p1524_p9)
}
  0x33   :  { %52 = dma.hbm_to_vmem [thread:$0]  %s2105_s2, 1024, %s47_s28, [#allocation9], %s1582_s13, %s1582_s13, %s1583_s14  }
  0x34   :  { %1572 = dma.done.wait [#allocation6], 256  }
  0x35   :  { %1573 = vsyncadd [#allocation6], 4294967040 }
  0x36   :  { %1574 = dma.done.wait [#allocation9], 1280  }
  0x37   :  { %1575 = vsyncadd [#allocation9], 4294966016  ;;  %v1585_v0 = vmov 0   ;;  %v1351_v1 = vld [vmem:[#allocation8 + $0x4] ss:$8 sps:$4 sm:$0xff]   ;;  %v70_v3 = vld [vmem:[#allocation5] sm:$0xff]  ;;  %v133_v19 = vlaneseq }
  0x38   :  { %121 = vmatprep.mubr.bf16.mxu0 %v1585_v0  ;;  %363 = vmatprep.mubr.bf16.mxu1 %v1585_v0  ;;  %v1353_v2 = vld [vmem:[#allocation8] ss:$8 sps:$4 sm:$0xff]   ;;  %v71_v4 = vld [vmem:[#allocation5 + $0x8] sm:$0xff]  ;;  %vm85_vm0 = vcmask 130048   ;;  %v1691_v8 = vld [vmem:[#allocation10 + $0x14] ss:$8 sps:$4 sm:$0xff]  }
  0x39   :  { %89 = vmatprep.subr.bf16.mxu0 %v1351_v1  ;;  %v72_v5 = vpack.c.bf16 %v71_v4, %v70_v3  ;;  %v1686_v6 = vld [vmem:[#allocation10 + $0x4] ss:$8 sps:$4 sm:$0xff]   ;;  %v1688_v7 = vld [vmem:[#allocation10] ss:$8 sps:$4 sm:$0xff]   ;;  %v1695_v9 = vld [vmem:[#allocation10 + $0x10] ss:$8 sps:$4 sm:$0xff]  }
  0x3a   :  { %90 = vmatpush1.bf16.msra.mxu0 %v1353_v2  ;;  %331 = vmatprep.subr.bf16.mxu1 %v1686_v6  ;;  %vm254_vm1 = vcmask 517120   ;;  %v1698_v10 = vld [vmem:[#allocation10 + $0x24] ss:$8 sps:$4 sm:$0xff]   ;;  %v253_v11 = vld [vmem:[%s2107_s4] sm:$0x3]  ;;  %s1586_s4 = smov 64  }
  0x3b   :  { %450 = vmatprep.subr.bf16.mxu0 %v1686_v6  ;;  %332 = vmatpush1.bf16.msra.mxu1 %v1688_v7  ;;  %v256_v12 = vld [vmem:[%s2108_s5] sm:$0x3]  ;;  %255 = vst.msk [vmem:[#allocation3] sm:$0x3] %vm254_vm1, %v253_v11  ;;  %v1712_v13 = vld [vmem:[#allocation10 + $0x20] ss:$8 sps:$4 sm:$0xff]  }
  0x3c   :  { %333 = vmatprep.subr.bf16.mxu1 %v1691_v8  ;;  %257 = vst.msk [vmem:[#allocation4] sm:$0x3] %vm254_vm1, %v256_v12  ;;  %v1715_v14 = vld [vmem:[#allocation10 + $0x34] ss:$8 sps:$4 sm:$0xff]   ;;  %v1720_v15 = vld [vmem:[#allocation10 + $0x30] ss:$8 sps:$4 sm:$0xff]  }
  0x3d   :  { %1286 = vmatmul.mubr.msk.bf16.vlgmr.msra.gmra.mrb[0].mxu0 %vm85_vm0, %v72_v5  ;;  %vm327_vm2 = vcmask 523264   ;;  %v134_v20 = vshrl.u32 %v133_v19, 7  ;;  %v69_v22 = vld [vmem:[%s2106_s3] sm:$0x3]  ;;  %v1587_v24 = vmov 1983009808  }
  0x3e   :  { %451 = vmatpush1.bf16.msra.mxu0 %v1688_v7  ;;  %482 = vmatprep.mubr.bf16.mxu0 %v1585_v0  ;;  %v151_v25 = vunpack.c.l.s4 %v1587_v24  ;;  %v219_v40 = vand.u32 127, %v133_v19  ;;  %vm411_vm6 = vcmask 254976   ;;  %s1588_s3 = smov 32   ;;  %s1589_s18 = smov [#allocation11]  }
  0x3f   :  { %452 = vmatprep.subr.bf16.mxu0 %v1691_v8  ;;  %334 = vmatpush1.bf16.msra.mxu1 %v1695_v9  ;;  %v135_v21 = vsub.s32 0, %v134_v20  ;;  %v139_v23 = vsub.s32 1, %v134_v20  ;;  %s1255_s19 = sshll.u32 %s1589_s18, 4  ;;  %s1590_s20 = smov [#allocation12]   ;;  %s1256_s19 = int_to_ptr.vmem [resolvable:$true] %s1255_s19 }
  0x40   :  { %335 = vmatprep.subr.bf16.mxu1 %v1698_v10  ;;  %v152_v28 = vunpack.c.0.s8 %v151_v25  ;;  %v1743_v49 = vadd.s32 128, %v219_v40  ;;  %v231_v52 = vand.u32 63, %v219_v40  ;;  %s1267_s21 = sshll.u32 %s1590_s20, 4  ;;  %s1528_s22 = scalar_lea.vmem %s1256_s19, 256  ;;  %s2064_s21 = int_to_ptr.vmem [resolvable:$true] %s1267_s21 }
  0x41   :  { %v136_v26 = vrot.slane %v69_v22, %v135_v21  ;;  %v140_v27 = vrot.slane %v69_v22, %v139_v23  ;;  %p1529_p10 = scmp.ne.s32.totalorder %s1256_s19, %s1528_s22  ;;  %p1533_p11 = scmp.lt.s32.totalorder %s1256_s19, %s1256_s19 }
  0x42   :  { %453 = vmatpush1.bf16.msra.mxu0 %v1695_v9  ;;  %v258_v16 = vld [vmem:[#allocation3] sm:$0x3]  ;;  %v155_v33 = vsub.s32 %v152_v28, %v134_v20  ;;  %v238_v53 = vand.u32 63, %v1743_v49  ;;  %vm1748_vm3 = vcmp.lt.s32.totalorder %v231_v52, 32  ;;  %vm224_vm5 = vcmp.lt.s32.totalorder %v1743_v49, 192  ;;  %p1534_p12 = scmp.lt.s32.totalorder %s1528_s22, %s1528_s22 }
  0x43   :  { %454 = vmatprep.subr.bf16.mxu0 %v1698_v10  ;;  %336 = vmatpush1.bf16.msra.mxu1 %v1712_v13  ;;  %v259_v17 = vld [vmem:[#allocation4] sm:$0x3]  ;;  %v260_v18 = vpack.c.bf16 %v258_v16, %v258_v16 }
  0x44   :  { %337 = vmatprep.subr.bf16.mxu1 %v1715_v14  ;;  %389 = vrot.lane.b32.xlu0 %v259_v17, %s1586_s4  ;;  %vm1758_vm4 = vcmp.lt.s32.totalorder %v238_v53, 32  ;;  %p1535_p13 = por %p1534_p12, %p1533_p11 }
  0x46   :  { %455 = vmatpush1.bf16.msra.mxu0 %v1712_v13  ;;  %p1536_p0 = pnand %p1535_p13, %p1529_p10 }
  0x47   :  { %456 = vmatprep.subr.bf16.mxu0 %v1715_v14  ;;  %338 = vmatpush1.bf16.msra.mxu1 %v1720_v15 }
  0x48   :  { %569 = vmatprep.subr.bf16.mxu1 %v1686_v6 }
  0x4a   :  { %457 = vmatpush1.bf16.msra.mxu0 %v1720_v15  ;;  %1301 = vmatmul.mubr.msk.bf16.vlgmr.msra.gmra.mrb[0].mxu1 %vm327_vm2, %v260_v18 }
  0x4b   :  { %688 = vmatprep.subr.bf16.mxu0 %v1686_v6  ;;  %570 = vmatpush1.bf16.msra.mxu1 %v1688_v7 }
  0x4c   :  { %601 = vmatprep.mubr.bf16.mxu1 %v1585_v0  ;;  %571 = vmatprep.subr.bf16.mxu1 %v1691_v8 }
  0x4f   :  { %572 = vmatpush1.bf16.msra.mxu1 %v1695_v9 }
  0x50   :  { %573 = vmatprep.subr.bf16.mxu1 %v1698_v10 }
  0x53   :  { %574 = vmatpush1.bf16.msra.mxu1 %v1712_v13 }
  0x54   :  { %575 = vmatprep.subr.bf16.mxu1 %v1715_v14 }
  0x57   :  { %576 = vmatpush1.bf16.msra.mxu1 %v1720_v15 }
  0x58   :  { %807 = vmatprep.subr.bf16.mxu1 %v1686_v6 }
 0x110   :  { %v123_v29 = vpop.f32.mrb[0].mxu0 }
 0x111   :  { %v143_v30 = vadd.f32 %v136_v26, %v123_v29  ;;  %v125_v31 = vpop.f32.mrb[1].mxu0 }
 0x112   :  { %v144_v32 = vadd.f32 %v140_v27, %v125_v31  ;;  %v127_v34 = vpop.f32.mrb[2].mxu0 }
 0x113   :  { %v145_v35 = vadd.f32 %v136_v26, %v127_v34  ;;  %v129_v36 = vpop.f32.mrb[3].mxu0 }
 0x114   :  { %v149_v37 = vcombine.low %v143_v30, %v144_v32  ;;  %v163_v38 = vcombine.high %v143_v30, %v144_v32  ;;  %v146_v39 = vadd.f32 %v140_v27, %v129_v36 }
 0x116   :  { %v156_v41 = vrot.slane %v149_v37, %v155_v33  ;;  %1287 = vst.sshfl [vmem:[#allocation2] sm:$0x33 pattern:$0x76325410] %v149_v37  ;;  %v170_v42 = vrot.slane %v163_v38, %v155_v33  ;;  %v180_v43 = vcombine.low %v145_v35, %v146_v39  ;;  %v195_v44 = vcombine.high %v145_v35, %v146_v39 }
 0x117   :  { %1288 = vst.sshfl [vmem:[#allocation2 + $0x8] sm:$0x33 pattern:$0x76325410] %v163_v38 }
 0x118   :  { %v159_v45 = vcombine.high %v156_v41, %v156_v41  ;;  %v174_v46 = vcombine.high %v170_v42, %v170_v42  ;;  %v187_v47 = vrot.slane %v180_v43, %v155_v33  ;;  %1289 = vst.sshfl [vmem:[#allocation2 + $0x10] sm:$0x33 pattern:$0x76325410] %v180_v43  ;;  %v202_v48 = vrot.slane %v195_v44, %v155_v33 }
 0x119   :  { %1290 = vst.sshfl [vmem:[#allocation2 + $0x18] sm:$0x33 pattern:$0x76325410] %v195_v44  ;;  %v390_v44 = vpop.permute.xlu0 %389 }
 0x11a   :  { %162 = vst [vmem:[#allocation2 + $0x4] sm:$0xf] %v159_v45  ;;  %177 = vst [vmem:[#allocation2 + $0xc] sm:$0xf] %v174_v46  ;;  %v191_v50 = vcombine.high %v187_v47, %v187_v47  ;;  %v206_v51 = vcombine.high %v202_v48, %v202_v48 }
 0x11c   :  { %194 = vst [vmem:[#allocation2 + $0x14] sm:$0xf] %v191_v50  ;;  %209 = vst [vmem:[#allocation2 + $0x1c] sm:$0xf] %v206_v51 }
 0x11d   :  { %v1746_v54 = vld.sshfl [vmem:[#allocation2] sm:$0x33 pattern:$0x76325410]  ;;  %v365_v55 = vpop.f32.mrb[0].mxu1 }
 0x11e   :  { %v367_v57 = vpop.f32.mrb[1].mxu1  ;;  %v1754_v60 = vld.sshfl [vmem:[#allocation2 + $0x8] sm:$0x33 pattern:$0x76325410]  ;;  %v1782_v12 = vcombine.high %v1746_v54, %v1746_v54 }
 0x11f   :  { %v369_v59 = vpop.f32.mrb[2].mxu1  ;;  %v1756_v61 = vld.sshfl [vmem:[#allocation2 + $0x10] sm:$0x33 pattern:$0x76325410]  ;;  %v1812_v24 = vcombine.high %v1754_v60, %v1754_v60 }
 0x120   :  { %v1752_v58 = vld.sshfl [vmem:[#allocation2 + $0x18] sm:$0x33 pattern:$0x76325410]  ;;  %v370_v63 = vpop.f32.mrb[3].mxu1  ;;  %v1804_v21 = vcombine.high %v1756_v61, %v1756_v61 }
 0x121   :  { %v1762_v1 = vld.sshfl [vmem:[#allocation2 + $0x4] sm:$0x33 pattern:$0x76325410]  ;;  %v1770_v3 = vcombine.high %v1752_v58, %v1752_v58 }
 0x122   :  { %v1766_v2 = vcombine.high %v1762_v1, %v1762_v1  ;;  %v1772_v4 = vld.sshfl [vmem:[#allocation2 + $0xc] sm:$0x33 pattern:$0x76325410]  ;;  %v1040_v5 = vsel %vm1748_vm3, %v1752_v58, %v1762_v1  ;;  %v445_v59 = vsel %vm1748_vm3, %v1762_v1, %v1752_v58 }
 0x123   :  { %v1778_v11 = vld.sshfl [vmem:[#allocation2 + $0x1c] sm:$0x33 pattern:$0x76325410]  ;;  %v1786_v16 = vcombine.high %v1772_v4, %v1772_v4  ;;  %v802_v17 = vsel %vm1748_vm3, %v1756_v61, %v1772_v4 }
 0x124   :  { %v1794_v18 = vcombine.high %v1778_v11, %v1778_v11  ;;  %v285_v19 = vsel %vm1748_vm3, %v1746_v54, %v1778_v11  ;;  %v1800_v20 = vld.sshfl [vmem:[#allocation2 + $0x14] sm:$0x33 pattern:$0x76325410]  ;;  %v1041_v22 = vsel %vm1758_vm4, %v1770_v3, %v1766_v2  ;;  %v1159_v29 = vsel %vm1748_vm3, %v1778_v11, %v1746_v54 }
 0x125   :  { %v366_v23 = vadd.f32 %v365_v55, %v285_v19  ;;  %v1816_v25 = vcombine.high %v1800_v20, %v1800_v20  ;;  %v803_v27 = vsel %vm1758_vm4, %v1804_v21, %v1786_v16  ;;  %v921_v28 = vsel %vm1748_vm3, %v1800_v20, %v1754_v60 }
 0x126   :  { %v286_v26 = vsel %vm1758_vm4, %v1782_v12, %v1794_v18  ;;  %v1160_v33 = vsel %vm1758_vm4, %v1794_v18, %v1782_v12 }
 0x127   :  { %v1302_v30 = vmul.f32 -1.442695, %v366_v23  ;;  %v368_v31 = vadd.f32 %v367_v57, %v286_v26  ;;  %v922_v32 = vsel %vm1758_vm4, %v1816_v25, %v1812_v24  ;;  %v446_v23 = vsel %vm1758_vm4, %v1766_v2, %v1770_v3 }
 0x129   :  { %1366 = vpow2.f32 %v1302_v30  ;;  %v1303_v34 = vmul.f32 -1.442695, %v368_v31 }
 0x12b   :  { %1368 = vpow2.f32 %v1303_v34 }
 0x12c   :  { %1370 = vtanh.f32 %v368_v31 }
 0x133   :  { %v1367_v35 = vpop.eup %1366 }
 0x134   :  { %v380_v37 = vadd.f32 1.0, %v1367_v35 }
 0x135   :  { %v1369_v36 = vpop.eup %1368 }
 0x136   :  { %v381_v38 = vadd.f32 1.0, %v1369_v36  ;;  %v1371_v39 = vpop.eup %1370 }
 0x138   :  { %1372 = vrcp.f32 %v381_v38 }
 0x139   :  { %1374 = vrcp.f32 %v380_v37 }
 0x142   :  { %v1373_v40 = vpop.eup %1372 }
 0x143   :  { %v1375_v41 = vpop.eup %1374  ;;  %v387_v42 = vsel %vm224_vm5, %v1371_v39, %v1373_v40 }
 0x144   :  { %v393_v43 = vmul.f32 %v1375_v41, %v387_v42  ;;  %v392_v45 = vmul.f32 %v1375_v41, %v390_v44 }
 0x146   :  { %395 = vrot.lane.b32.xlu0 %v393_v43, %s1586_s4 }
 0x1b8   :  { %v396_v46 = vpop.permute.xlu0 %395 }
 0x1b9   :  { %v398_v47 = vadd.f32 %v396_v46, %v392_v45 }
 0x1bb   :  { %1376 = vtanh.f32 %v398_v47 }
 0x1c5   :  { %v1377_v48 = vpop.eup %1376 }
 0x1c6   :  { %v1846_v50 = vmul.f32 %v1377_v48, %v387_v42 }
 0x1c8   :  { %402 = vrot.lane.b32.xlu1 %v1846_v50, %s1586_s4 }
 0x1cc   :  { %407 = vrot.lane.b32.xlu1 %v398_v47, %s1586_s4 }
 0x23a   :  { %v403_v51 = vpop.permute.xlu1 %402 }
 0x23b   :  { %405 = vst.msk [vmem:[#allocation3] sm:$0x3] %vm254_vm1, %v403_v51 }
 0x23c   :  { %412 = vst.msk [vmem:[#allocation11] sm:$0x3] %vm411_vm6, %v403_v51 }
 0x23e   :  { %v408_v52 = vpop.permute.xlu1 %407 }
 0x23f   :  { %410 = vst.msk [vmem:[#allocation4] sm:$0x3] %vm254_vm1, %v408_v52 }
 0x242   :  { %v418_v53 = vld [vmem:[#allocation3] sm:$0x3] }
 0x243   :  { %v420_v55 = vpack.c.bf16 %v418_v53, %v418_v53 }
 0x245   :  { %1306 = vmatmul.mubr.msk.bf16.vlgmr.msra.gmra.mrb[4].mxu0 %vm327_vm2, %v420_v55 }
 0x246   :  { %v419_v57 = vld [vmem:[#allocation4] sm:$0x3]  ;;  %689 = vmatpush1.bf16.msra.mxu0 %v1688_v7  ;;  %720 = vmatprep.mubr.bf16.mxu0 %v1585_v0 }
 0x247   :  { %508 = vrot.lane.b32.xlu0 %v419_v57, %s1586_s4  ;;  %690 = vmatprep.subr.bf16.mxu0 %v1691_v8 }
 0x24a   :  { %691 = vmatpush1.bf16.msra.mxu0 %v1695_v9 }
 0x24b   :  { %692 = vmatprep.subr.bf16.mxu0 %v1698_v10 }
 0x24e   :  { %693 = vmatpush1.bf16.msra.mxu0 %v1712_v13 }
 0x24f   :  { %694 = vmatprep.subr.bf16.mxu0 %v1715_v14 }
 0x252   :  { %695 = vmatpush1.bf16.msra.mxu0 %v1720_v15 }
 0x253   :  { %926 = vmatprep.subr.bf16.mxu0 %v1686_v6 }
 0x2b9   :  { %v509_v46 = vpop.permute.xlu0 %508 }
 0x318   :  { %v484_v63 = vpop.f32.mrb[4].mxu0 }
 0x319   :  { %v485_v19 = vadd.f32 %v484_v63, %v445_v59  ;;  %v486_v26 = vpop.f32.mrb[5].mxu0 }
 0x31a   :  { %v487_v30 = vadd.f32 %v486_v26, %v446_v23  ;;  %v488_v31 = vpop.f32.mrb[6].mxu0  ;;  %v564_v23 = vsel %vm1748_vm3, %v1754_v60, %v1800_v20 }
 0x31b   :  { %v1307_v34 = vmul.f32 -1.442695, %v485_v19  ;;  %v489_v35 = vpop.f32.mrb[7].mxu0  ;;  %v565_v31 = vsel %vm1758_vm4, %v1812_v24, %v1816_v25 }
 0x31c   :  { %v1308_v36 = vmul.f32 -1.442695, %v487_v30 }
 0x31d   :  { %1378 = vpow2.f32 %v1307_v34 }
 0x31e   :  { %1380 = vpow2.f32 %v1308_v36 }
 0x31f   :  { %1382 = vtanh.f32 %v487_v30 }
 0x327   :  { %v1379_v37 = vpop.eup %1378 }
 0x328   :  { %v1381_v38 = vpop.eup %1380  ;;  %v499_v39 = vadd.f32 1.0, %v1379_v37 }
 0x329   :  { %v500_v40 = vadd.f32 1.0, %v1381_v38  ;;  %v1383_v41 = vpop.eup %1382 }
 0x32b   :  { %1384 = vrcp.f32 %v500_v40 }
 0x32c   :  { %1386 = vrcp.f32 %v499_v39 }
 0x335   :  { %v1385_v42 = vpop.eup %1384 }
 0x336   :  { %v1387_v43 = vpop.eup %1386  ;;  %v506_v44 = vsel %vm224_vm5, %v1383_v41, %v1385_v42 }
 0x337   :  { %v512_v45 = vmul.f32 %v1387_v43, %v506_v44  ;;  %v511_v47 = vmul.f32 %v1387_v43, %v509_v46 }
 0x339   :  { %514 = vrot.lane.b32.xlu1 %v512_v45, %s1586_s4 }
 0x3ab   :  { %v515_v48 = vpop.permute.xlu1 %514 }
 0x3ac   :  { %v517_v51 = vadd.f32 %v515_v48, %v511_v47 }
 0x3ae   :  { %1388 = vtanh.f32 %v517_v51  ;;  %526 = vrot.lane.b32.xlu1 %v517_v51, %s1586_s4 }
 0x3b8   :  { %v1389_v52 = vpop.eup %1388 }
 0x3b9   :  { %v1877_v53 = vmul.f32 %v1389_v52, %v506_v44 }
 0x3bb   :  { %521 = vrot.lane.b32.xlu0 %v1877_v53, %s1586_s4 }
 0x420   :  { %v527_v55 = vpop.permute.xlu1 %526 }
 0x421   :  { %529 = vst.msk [vmem:[#allocation4] sm:$0x3] %vm254_vm1, %v527_v55 }
 0x428   :  { %v538_v57 = vld [vmem:[#allocation4] sm:$0x3] }
 0x429   :  { %627 = vrot.lane.b32.xlu0 %v538_v57, %s1586_s4 }
 0x42d   :  { %v522_v59 = vpop.permute.xlu0 %521 }
 0x42e   :  { %524 = vst.msk [vmem:[#allocation3] sm:$0x3] %vm254_vm1, %v522_v59 }
 0x42f   :  { %531 = vst.msk [vmem:[#allocation11 + $0x2] sm:$0x3] %vm411_vm6, %v522_v59 }
 0x435   :  { %v537_v63 = vld [vmem:[#allocation3] sm:$0x3] }
 0x436   :  { %v539_v19 = vpack.c.bf16 %v537_v63, %v537_v63 }
 0x438   :  { %1311 = vmatmul.mubr.msk.bf16.vlgmr.msra.gmra.mrb[4].mxu1 %vm327_vm2, %v539_v19 }
 0x439   :  { %808 = vmatpush1.bf16.msra.mxu1 %v1688_v7  ;;  %839 = vmatprep.mubr.bf16.mxu1 %v1585_v0 }
 0x43a   :  { %809 = vmatprep.subr.bf16.mxu1 %v1691_v8 }
 0x43d   :  { %810 = vmatpush1.bf16.msra.mxu1 %v1695_v9 }
 0x43e   :  { %811 = vmatprep.subr.bf16.mxu1 %v1698_v10 }
 0x441   :  { %812 = vmatpush1.bf16.msra.mxu1 %v1712_v13 }
 0x442   :  { %813 = vmatprep.subr.bf16.mxu1 %v1715_v14 }
 0x445   :  { %814 = vmatpush1.bf16.msra.mxu1 %v1720_v15 }
 0x446   :  { %1045 = vmatprep.subr.bf16.mxu1 %v1686_v6 }
 0x49b   :  { %v628_v51 = vpop.permute.xlu0 %627 }
 0x50b   :  { %v603_v26 = vpop.f32.mrb[4].mxu1 }
 0x50c   :  { %v604_v30 = vadd.f32 %v603_v26, %v564_v23  ;;  %v605_v34 = vpop.f32.mrb[5].mxu1 }
 0x50d   :  { %v606_v35 = vadd.f32 %v605_v34, %v565_v31  ;;  %v607_v36 = vpop.f32.mrb[6].mxu1  ;;  %v683_v34 = vsel %vm1748_vm3, %v1772_v4, %v1756_v61 }
 0x50e   :  { %v1312_v37 = vmul.f32 -1.442695, %v604_v30  ;;  %v608_v38 = vpop.f32.mrb[7].mxu1 }
 0x50f   :  { %v1313_v39 = vmul.f32 -1.442695, %v606_v35 }
 0x510   :  { %1390 = vpow2.f32 %v1312_v37  ;;  %v684_v37 = vsel %vm1758_vm4, %v1786_v16, %v1804_v21 }
 0x511   :  { %1392 = vpow2.f32 %v1313_v39 }
 0x512   :  { %1394 = vtanh.f32 %v606_v35 }
 0x51a   :  { %v1391_v40 = vpop.eup %1390 }
 0x51b   :  { %v1393_v41 = vpop.eup %1392  ;;  %v618_v42 = vadd.f32 1.0, %v1391_v40 }
 0x51c   :  { %v619_v43 = vadd.f32 1.0, %v1393_v41  ;;  %v1395_v44 = vpop.eup %1394 }
 0x51e   :  { %1396 = vrcp.f32 %v619_v43 }
 0x51f   :  { %1398 = vrcp.f32 %v618_v42 }
 0x528   :  { %v1397_v45 = vpop.eup %1396 }
 0x529   :  { %v1399_v46 = vpop.eup %1398  ;;  %v625_v47 = vsel %vm224_vm5, %v1395_v44, %v1397_v45 }
 0x52a   :  { %v631_v48 = vmul.f32 %v1399_v46, %v625_v47  ;;  %v630_v52 = vmul.f32 %v1399_v46, %v628_v51 }
 0x52c   :  { %633 = vrot.lane.b32.xlu1 %v631_v48, %s1586_s4 }
 0x59e   :  { %v634_v55 = vpop.permute.xlu1 %633 }
 0x59f   :  { %v636_v57 = vadd.f32 %v634_v55, %v630_v52 }
 0x5a1   :  { %1400 = vtanh.f32 %v636_v57  ;;  %645 = vrot.lane.b32.xlu1 %v636_v57, %s1586_s4 }
 0x5ab   :  { %v1401_v59 = vpop.eup %1400 }
 0x5ac   :  { %v1907_v63 = vmul.f32 %v1401_v59, %v625_v47 }
 0x5ae   :  { %640 = vrot.lane.b32.xlu0 %v1907_v63, %s1586_s4 }
 0x613   :  { %v646_v19 = vpop.permute.xlu1 %645 }
 0x614   :  { %648 = vst.msk [vmem:[#allocation4] sm:$0x3] %vm254_vm1, %v646_v19 }
 0x61b   :  { %v657_v23 = vld [vmem:[#allocation4] sm:$0x3] }
 0x61c   :  { %746 = vrot.lane.b32.xlu0 %v657_v23, %s1586_s4 }
 0x620   :  { %v641_v26 = vpop.permute.xlu0 %640 }
 0x621   :  { %643 = vst.msk [vmem:[#allocation3] sm:$0x3] %vm254_vm1, %v641_v26 }
 0x622   :  { %650 = vst.msk [vmem:[#allocation11 + $0x4] sm:$0x3] %vm411_vm6, %v641_v26 }
 0x628   :  { %v656_v30 = vld [vmem:[#allocation3] sm:$0x3] }
 0x629   :  { %v658_v31 = vpack.c.bf16 %v656_v30, %v656_v30 }
 0x62b   :  { %1316 = vmatmul.mubr.msk.bf16.vlgmr.msra.gmra.mrb[8].mxu0 %vm327_vm2, %v658_v31 }
 0x62c   :  { %927 = vmatpush1.bf16.msra.mxu0 %v1688_v7  ;;  %958 = vmatprep.mubr.bf16.mxu0 %v1585_v0 }
 0x62d   :  { %928 = vmatprep.subr.bf16.mxu0 %v1691_v8 }
 0x630   :  { %929 = vmatpush1.bf16.msra.mxu0 %v1695_v9 }
 0x631   :  { %930 = vmatprep.subr.bf16.mxu0 %v1698_v10 }
 0x634   :  { %931 = vmatpush1.bf16.msra.mxu0 %v1712_v13 }
 0x635   :  { %932 = vmatprep.subr.bf16.mxu0 %v1715_v14 }
 0x638   :  { %933 = vmatpush1.bf16.msra.mxu0 %v1720_v15 }
 0x639   :  { %1164 = vmatprep.subr.bf16.mxu0 %v1686_v6 }
 0x68e   :  { %v747_v57 = vpop.permute.xlu0 %746 }
 0x6fe   :  { %v722_v35 = vpop.f32.mrb[8].mxu0 }
 0x6ff   :  { %v723_v36 = vadd.f32 %v722_v35, %v683_v34  ;;  %v724_v38 = vpop.f32.mrb[9].mxu0 }
 0x700   :  { %v725_v39 = vadd.f32 %v724_v38, %v684_v37  ;;  %v726_v40 = vpop.f32.mrb[10].mxu0 }
 0x701   :  { %v1317_v41 = vmul.f32 -1.442695, %v723_v36  ;;  %v727_v42 = vpop.f32.mrb[11].mxu0 }
 0x702   :  { %v1318_v43 = vmul.f32 -1.442695, %v725_v39 }
 0x703   :  { %1402 = vpow2.f32 %v1317_v41 }
 0x704   :  { %1404 = vpow2.f32 %v1318_v43 }
 0x705   :  { %1406 = vtanh.f32 %v725_v39 }
 0x70d   :  { %v1403_v6 = vpop.eup %1402 }
 0x70e   :  { %v1405_v44 = vpop.eup %1404  ;;  %v737_v45 = vadd.f32 1.0, %v1403_v6 }
 0x70f   :  { %v738_v46 = vadd.f32 1.0, %v1405_v44  ;;  %v1407_v47 = vpop.eup %1406 }
 0x711   :  { %1408 = vrcp.f32 %v738_v46 }
 0x712   :  { %1410 = vrcp.f32 %v737_v45 }
 0x71b   :  { %v1409_v48 = vpop.eup %1408 }
 0x71c   :  { %v1411_v51 = vpop.eup %1410  ;;  %v744_v52 = vsel %vm224_vm5, %v1407_v47, %v1409_v48 }
 0x71d   :  { %v750_v55 = vmul.f32 %v1411_v51, %v744_v52  ;;  %v749_v59 = vmul.f32 %v1411_v51, %v747_v57 }
 0x71f   :  { %752 = vrot.lane.b32.xlu1 %v750_v55, %s1586_s4 }
 0x791   :  { %v753_v19 = vpop.permute.xlu1 %752 }
 0x792   :  { %v755_v23 = vadd.f32 %v753_v19, %v749_v59 }
 0x794   :  { %1412 = vtanh.f32 %v755_v23  ;;  %764 = vrot.lane.b32.xlu1 %v755_v23, %s1586_s4 }
 0x79e   :  { %v1413_v26 = vpop.eup %1412 }
 0x79f   :  { %v1937_v30 = vmul.f32 %v1413_v26, %v744_v52 }
 0x7a1   :  { %759 = vrot.lane.b32.xlu0 %v1937_v30, %s1586_s4 }
 0x806   :  { %v765_v31 = vpop.permute.xlu1 %764 }
 0x807   :  { %767 = vst.msk [vmem:[#allocation4] sm:$0x3] %vm254_vm1, %v765_v31 }
 0x80e   :  { %v776_v34 = vld [vmem:[#allocation4] sm:$0x3] }
 0x80f   :  { %865 = vrot.lane.b32.xlu0 %v776_v34, %s1586_s4 }
 0x813   :  { %v760_v35 = vpop.permute.xlu0 %759 }
 0x814   :  { %762 = vst.msk [vmem:[#allocation3] sm:$0x3] %vm254_vm1, %v760_v35 }
 0x815   :  { %769 = vst.msk [vmem:[#allocation11 + $0x6] sm:$0x3] %vm411_vm6, %v760_v35 }
 0x81b   :  { %v775_v36 = vld [vmem:[#allocation3] sm:$0x3] }
 0x81c   :  { %v777_v37 = vpack.c.bf16 %v775_v36, %v775_v36 }
 0x81e   :  { %1321 = vmatmul.mubr.msk.bf16.vlgmr.msra.gmra.mrb[8].mxu1 %vm327_vm2, %v777_v37 }
 0x81f   :  { %1046 = vmatpush1.bf16.msra.mxu1 %v1688_v7  ;;  %1077 = vmatprep.mubr.bf16.mxu1 %v1585_v0 }
 0x820   :  { %1047 = vmatprep.subr.bf16.mxu1 %v1691_v8 }
 0x823   :  { %1048 = vmatpush1.bf16.msra.mxu1 %v1695_v9 }
 0x824   :  { %1049 = vmatprep.subr.bf16.mxu1 %v1698_v10 }
 0x827   :  { %1050 = vmatpush1.bf16.msra.mxu1 %v1712_v13 }
 0x828   :  { %1051 = vmatprep.subr.bf16.mxu1 %v1715_v14 }
 0x82b   :  { %1052 = vmatpush1.bf16.msra.mxu1 %v1720_v15 }
 0x8f1   :  { %v841_v38 = vpop.f32.mrb[8].mxu1 }
 0x8f2   :  { %v842_v39 = vadd.f32 %v841_v38, %v802_v17  ;;  %v843_v40 = vpop.f32.mrb[9].mxu1 }
 0x8f3   :  { %v844_v41 = vadd.f32 %v843_v40, %v803_v27  ;;  %v845_v42 = vpop.f32.mrb[10].mxu1  ;;  %v866_v27 = vpop.permute.xlu0 %865 }
 0x8f4   :  { %v1322_v43 = vmul.f32 -1.442695, %v842_v39  ;;  %v846_v6 = vpop.f32.mrb[11].mxu1 }
 0x8f5   :  { %v1323_v44 = vmul.f32 -1.442695, %v844_v41 }
 0x8f6   :  { %1414 = vpow2.f32 %v1322_v43 }
 0x8f7   :  { %1416 = vpow2.f32 %v1323_v44 }
 0x8f8   :  { %1418 = vtanh.f32 %v844_v41 }
 0x900   :  { %v1415_v45 = vpop.eup %1414 }
 0x901   :  { %v1417_v46 = vpop.eup %1416  ;;  %v856_v47 = vadd.f32 1.0, %v1415_v45 }
 0x902   :  { %v857_v48 = vadd.f32 1.0, %v1417_v46  ;;  %v1419_v61 = vpop.eup %1418 }
 0x904   :  { %1420 = vrcp.f32 %v857_v48 }
 0x905   :  { %1422 = vrcp.f32 %v856_v47 }
 0x90e   :  { %v1421_v4 = vpop.eup %1420 }
 0x90f   :  { %v1423_v17 = vpop.eup %1422  ;;  %v863_v16 = vsel %vm224_vm5, %v1419_v61, %v1421_v4 }
 0x910   :  { %v869_v21 = vmul.f32 %v1423_v17, %v863_v16  ;;  %v868_v51 = vmul.f32 %v1423_v17, %v866_v27 }
 0x912   :  { %871 = vrot.lane.b32.xlu1 %v869_v21, %s1586_s4 }
 0x984   :  { %v872_v52 = vpop.permute.xlu1 %871 }
 0x985   :  { %v874_v55 = vadd.f32 %v872_v52, %v868_v51 }
 0x987   :  { %1424 = vtanh.f32 %v874_v55  ;;  %883 = vrot.lane.b32.xlu1 %v874_v55, %s1586_s4 }
 0x991   :  { %v1425_v57 = vpop.eup %1424 }
 0x992   :  { %v1968_v59 = vmul.f32 %v1425_v57, %v863_v16 }
 0x994   :  { %878 = vrot.lane.b32.xlu0 %v1968_v59, %s1586_s4 }
 0x9f9   :  { %v884_v19 = vpop.permute.xlu1 %883 }
 0x9fa   :  { %886 = vst.msk [vmem:[#allocation4] sm:$0x3] %vm254_vm1, %v884_v19 }
 0xa01   :  { %v895_v23 = vld [vmem:[#allocation4] sm:$0x3] }
 0xa02   :  { %984 = vrot.lane.b32.xlu0 %v895_v23, %s1586_s4 }
 0xa06   :  { %v879_v26 = vpop.permute.xlu0 %878 }
 0xa07   :  { %881 = vst.msk [vmem:[#allocation3] sm:$0x3] %vm254_vm1, %v879_v26 }
 0xa08   :  { %888 = vst.msk [vmem:[#allocation11 + $0x8] sm:$0x3] %vm411_vm6, %v879_v26 }
 0xa0e   :  { %v894_v31 = vld [vmem:[#allocation3] sm:$0x3] }
 0xa0f   :  { %v896_v34 = vpack.c.bf16 %v894_v31, %v894_v31 }
 0xa11   :  { %1326 = vmatmul.mubr.msk.bf16.vlgmr.msra.gmra.mrb[12].mxu0 %vm327_vm2, %v896_v34 }
 0xa12   :  { %1165 = vmatpush1.bf16.msra.mxu0 %v1688_v7  ;;  %1196 = vmatprep.mubr.bf16.mxu0 %v1585_v0 }
 0xa13   :  { %1166 = vmatprep.subr.bf16.mxu0 %v1691_v8 }
 0xa16   :  { %1167 = vmatpush1.bf16.msra.mxu0 %v1695_v9 }
 0xa17   :  { %1168 = vmatprep.subr.bf16.mxu0 %v1698_v10 }
 0xa1a   :  { %1169 = vmatpush1.bf16.msra.mxu0 %v1712_v13 }
 0xa1b   :  { %1170 = vmatprep.subr.bf16.mxu0 %v1715_v14 }
 0xa1e   :  { %1171 = vmatpush1.bf16.msra.mxu0 %v1720_v15 }
 0xae4   :  { %v960_v35 = vpop.f32.mrb[12].mxu0 }
 0xae5   :  { %v961_v7 = vadd.f32 %v960_v35, %v921_v28  ;;  %v962_v0 = vpop.f32.mrb[13].mxu0 }
 0xae6   :  { %v963_v8 = vadd.f32 %v962_v0, %v922_v32  ;;  %v964_v9 = vpop.f32.mrb[14].mxu0  ;;  %v985_v32 = vpop.permute.xlu0 %984 }
 0xae7   :  { %v1327_v10 = vmul.f32 -1.442695, %v961_v7  ;;  %v965_v13 = vpop.f32.mrb[15].mxu0 }
 0xae8   :  { %v1328_v14 = vmul.f32 -1.442695, %v963_v8 }
 0xae9   :  { %1426 = vpow2.f32 %v1327_v10 }
 0xaea   :  { %1428 = vpow2.f32 %v1328_v14 }
 0xaeb   :  { %1430 = vtanh.f32 %v963_v8 }
 0xaf3   :  { %v1427_v15 = vpop.eup %1426 }
 0xaf4   :  { %v1429_v36 = vpop.eup %1428  ;;  %v975_v37 = vadd.f32 1.0, %v1427_v15 }
 0xaf5   :  { %v976_v38 = vadd.f32 1.0, %v1429_v36  ;;  %v1431_v60 = vpop.eup %1430 }
 0xaf7   :  { %1432 = vrcp.f32 %v976_v38 }
 0xaf8   :  { %1434 = vrcp.f32 %v975_v37 }
 0xb01   :  { %v1433_v20 = vpop.eup %1432 }
 0xb02   :  { %v1435_v28 = vpop.eup %1434  ;;  %v982_v24 = vsel %vm224_vm5, %v1431_v60, %v1433_v20 }
 0xb03   :  { %v988_v25 = vmul.f32 %v1435_v28, %v982_v24  ;;  %v987_v39 = vmul.f32 %v1435_v28, %v985_v32 }
 0xb05   :  { %990 = vrot.lane.b32.xlu1 %v988_v25, %s1586_s4 }
 0xb77   :  { %v991_v40 = vpop.permute.xlu1 %990 }
 0xb78   :  { %v993_v41 = vadd.f32 %v991_v40, %v987_v39 }
 0xb7a   :  { %1436 = vtanh.f32 %v993_v41  ;;  %1002 = vrot.lane.b32.xlu1 %v993_v41, %s1586_s4 }
 0xb84   :  { %v1437_v42 = vpop.eup %1436 }
 0xb85   :  { %v1999_v43 = vmul.f32 %v1437_v42, %v982_v24 }
 0xb87   :  { %997 = vrot.lane.b32.xlu0 %v1999_v43, %s1586_s4 }
 0xbec   :  { %v1003_v6 = vpop.permute.xlu1 %1002 }
 0xbed   :  { %1005 = vst.msk [vmem:[#allocation4] sm:$0x3] %vm254_vm1, %v1003_v6 }
 0xbf4   :  { %v1014_v44 = vld [vmem:[#allocation4] sm:$0x3] }
 0xbf5   :  { %1103 = vrot.lane.b32.xlu0 %v1014_v44, %s1586_s4 }
 0xbf9   :  { %v998_v45 = vpop.permute.xlu0 %997 }
 0xbfa   :  { %1000 = vst.msk [vmem:[#allocation3] sm:$0x3] %vm254_vm1, %v998_v45 }
 0xbfb   :  { %1007 = vst.msk [vmem:[#allocation11 + $0xa] sm:$0x3] %vm411_vm6, %v998_v45 }
 0xc01   :  { %v1013_v46 = vld [vmem:[#allocation3] sm:$0x3] }
 0xc02   :  { %v1015_v47 = vpack.c.bf16 %v1013_v46, %v1013_v46 }
 0xc04   :  { %1331 = vmatmul.mubr.msk.bf16.vlgmr.msra.gmra.mrb[12].mxu1 %vm327_vm2, %v1015_v47 }
 0xcd7   :  { %v1079_v48 = vpop.f32.mrb[12].mxu1 }
 0xcd8   :  { %v1080_v61 = vadd.f32 %v1079_v48, %v1040_v5  ;;  %v1081_v4 = vpop.f32.mrb[13].mxu1 }
 0xcd9   :  { %v1082_v17 = vadd.f32 %v1081_v4, %v1041_v22  ;;  %v1083_v16 = vpop.f32.mrb[14].mxu1  ;;  %v1104_v22 = vpop.permute.xlu0 %1103 }
 0xcda   :  { %v1332_v21 = vmul.f32 -1.442695, %v1080_v61  ;;  %v1084_v27 = vpop.f32.mrb[15].mxu1 }
 0xcdb   :  { %v1333_v51 = vmul.f32 -1.442695, %v1082_v17 }
 0xcdc   :  { %1438 = vpow2.f32 %v1332_v21 }
 0xcdd   :  { %1440 = vpow2.f32 %v1333_v51 }
 0xcde   :  { %1442 = vtanh.f32 %v1082_v17 }
 0xce6   :  { %v1439_v52 = vpop.eup %1438 }
 0xce7   :  { %v1441_v55 = vpop.eup %1440  ;;  %v1094_v57 = vadd.f32 1.0, %v1439_v52 }
 0xce8   :  { %v1095_v19 = vadd.f32 1.0, %v1441_v55  ;;  %v1443_v58 = vpop.eup %1442 }
 0xcea   :  { %1444 = vrcp.f32 %v1095_v19 }
 0xceb   :  { %1446 = vrcp.f32 %v1094_v57 }
 0xcf4   :  { %v1445_v1 = vpop.eup %1444 }
 0xcf5   :  { %v1447_v5 = vpop.eup %1446  ;;  %v1101_v2 = vsel %vm224_vm5, %v1443_v58, %v1445_v1 }
 0xcf6   :  { %v1107_v3 = vmul.f32 %v1447_v5, %v1101_v2  ;;  %v1106_v23 = vmul.f32 %v1447_v5, %v1104_v22 }
 0xcf8   :  { %1109 = vrot.lane.b32.xlu1 %v1107_v3, %s1586_s4 }
 0xd6a   :  { %v1110_v26 = vpop.permute.xlu1 %1109 }
 0xd6b   :  { %v1112_v31 = vadd.f32 %v1110_v26, %v1106_v23 }
 0xd6d   :  { %1448 = vtanh.f32 %v1112_v31  ;;  %1121 = vrot.lane.b32.xlu1 %v1112_v31, %s1586_s4 }
 0xd77   :  { %v1449_v34 = vpop.eup %1448 }
 0xd78   :  { %v1114_v35 = vmul.f32 %v1449_v34, %v1101_v2 }
 0xd7a   :  { %1116 = vrot.lane.b32.xlu0 %v1114_v35, %s1586_s4 }
 0xddf   :  { %v1122_v7 = vpop.permute.xlu1 %1121 }
 0xde0   :  { %1124 = vst.msk [vmem:[#allocation4] sm:$0x3] %vm254_vm1, %v1122_v7 }
 0xde7   :  { %v1133_v0 = vld [vmem:[#allocation4] sm:$0x3] }
 0xde8   :  { %1222 = vrot.lane.b32.xlu0 %v1133_v0, %s1586_s4 }
 0xdec   :  { %413 = vrot.lane.b32.xlu0 %v1846_v50, %s1588_s3  ;;  %v1117_v8 = vpop.permute.xlu0 %1116 }
 0xded   :  { %1119 = vst.msk [vmem:[#allocation3] sm:$0x3] %vm254_vm1, %v1117_v8 }
 0xdee   :  { %1126 = vst.msk [vmem:[#allocation11 + $0xc] sm:$0x3] %vm411_vm6, %v1117_v8 }
 0xdf0   :  { %651 = vrot.lane.b32.xlu0 %v1907_v63, %s1588_s3 }
 0xdf4   :  { %889 = vrot.lane.b32.xlu0 %v1968_v59, %s1588_s3  ;;  %v1132_v9 = vld [vmem:[#allocation3] sm:$0x3] }
 0xdf5   :  { %v1134_v10 = vpack.c.bf16 %v1132_v9, %v1132_v9 }
 0xdf7   :  { %1336 = vmatmul.mubr.msk.bf16.vlgmr.msra.gmra.mrb[16].mxu0 %vm327_vm2, %v1134_v10 }
 0xdf8   :  { %1127 = vrot.lane.b32.xlu0 %v1114_v35, %s1588_s3 }
 0xe5a   :  { %v1223_v13 = vpop.permute.xlu0 %1222 }
 0xe5e   :  { %v414_v14 = vpop.permute.xlu0 %413 }
 0xe5f   :  { %417 = vst.msk [vmem:[#allocation12 + $0xe] sm:$0x3] %vm411_vm6, %v414_v14 }
 0xe62   :  { %v652_v50 = vpop.permute.xlu0 %651 }
 0xe63   :  { %655 = vst.msk [vmem:[#allocation12 + $0xa] sm:$0x3] %vm411_vm6, %v652_v50 }
 0xe66   :  { %v890_v15 = vpop.permute.xlu0 %889 }
 0xe67   :  { %893 = vst.msk [vmem:[#allocation12 + $0x6] sm:$0x3] %vm411_vm6, %v890_v15 }
 0xe6a   :  { %v1128_v63 = vpop.permute.xlu0 %1127 }
 0xe6b   :  { %1131 = vst.msk [vmem:[#allocation12 + $0x2] sm:$0x3] %vm411_vm6, %v1128_v63 }
 0xeca   :  { %v1198_v59 = vpop.f32.mrb[16].mxu0 }
 0xecb   :  { %v1199_v36 = vadd.f32 %v1198_v59, %v1159_v29  ;;  %v1200_v37 = vpop.f32.mrb[17].mxu0 }
 0xecc   :  { %v1201_v38 = vadd.f32 %v1200_v37, %v1160_v33  ;;  %v1202_v60 = vpop.f32.mrb[18].mxu0 }
 0xecd   :  { %v1337_v20 = vmul.f32 -1.442695, %v1199_v36  ;;  %v1203_v28 = vpop.f32.mrb[19].mxu0 }
 0xece   :  { %v1338_v24 = vmul.f32 -1.442695, %v1201_v38 }
 0xecf   :  { %1450 = vpow2.f32 %v1337_v20 }
 0xed0   :  { %1452 = vpow2.f32 %v1338_v24 }
 0xed1   :  { %1454 = vtanh.f32 %v1201_v38 }
 0xed9   :  { %v1451_v25 = vpop.eup %1450 }
 0xeda   :  { %v1453_v32 = vpop.eup %1452  ;;  %v1213_v56 = vadd.f32 1.0, %v1451_v25 }
 0xedb   :  { %v1214_v39 = vadd.f32 1.0, %v1453_v32  ;;  %v1455_v54 = vpop.eup %1454 }
 0xedd   :  { %1456 = vrcp.f32 %v1214_v39 }
 0xede   :  { %1458 = vrcp.f32 %v1213_v56 }
 0xee7   :  { %v1457_v11 = vpop.eup %1456 }
 0xee8   :  { %v1459_v62 = vpop.eup %1458  ;;  %v1220_v12 = vsel %vm224_vm5, %v1455_v54, %v1457_v11 }
 0xee9   :  { %v1226_v18 = vmul.f32 %v1459_v62, %v1220_v12  ;;  %v1225_v29 = vmul.f32 %v1459_v62, %v1223_v13 }
 0xeeb   :  { %1228 = vrot.lane.b32.xlu1 %v1226_v18, %s1586_s4 }
 0xeef   :  { %532 = vrot.lane.b32.xlu1 %v1877_v53, %s1588_s3 }
 0xef3   :  { %770 = vrot.lane.b32.xlu1 %v1937_v30, %s1588_s3 }
 0xef7   :  { %1008 = vrot.lane.b32.xlu1 %v1999_v43, %s1588_s3 }
 0xf5d   :  { %v1229_v33 = vpop.permute.xlu1 %1228 }
 0xf5e   :  { %v1231_v40 = vadd.f32 %v1229_v33, %v1225_v29 }
 0xf60   :  { %1460 = vtanh.f32 %v1231_v40 }
 0xf61   :  { %v533_v41 = vpop.permute.xlu1 %532 }
 0xf62   :  { %536 = vst.msk [vmem:[#allocation12 + $0xc] sm:$0x3] %vm411_vm6, %v533_v41 }
 0xf65   :  { %v771_v49 = vpop.permute.xlu1 %770 }
 0xf66   :  { %774 = vst.msk [vmem:[#allocation12 + $0x8] sm:$0x3] %vm411_vm6, %v771_v49 }
 0xf69   :  { %v1009_v42 = vpop.permute.xlu1 %1008 }
 0xf6a   :  { %v1461_v6 = vpop.eup %1460  ;;  %1012 = vst.msk [vmem:[#allocation12 + $0x4] sm:$0x3] %vm411_vm6, %v1009_v42 }
 0xf6b   :  { %v1233_v53 = vmul.f32 %v1461_v6, %v1220_v12 }
 0xf6d   :  { %1246 = vrot.lane.b32.xlu0 %v1233_v53, %s1588_s3  ;;  %1235 = vrot.lane.b32.xlu1 %v1233_v53, %s1586_s4 }
 0xf71   :  { %1240 = vrot.lane.b32.xlu1 %v1231_v40, %s1586_s4 }
 0xfdf   :  { %v1236_v30 = vpop.permute.xlu1 %1235  ;;  %v1247_v43 = vpop.permute.xlu0 %1246 }
 0xfe0   :  { %1238 = vst.msk [vmem:[#allocation3] sm:$0x3] %vm254_vm1, %v1236_v30 }
 0xfe1   :  { %1245 = vst.msk [vmem:[#allocation11 + $0xe] sm:$0x3] %vm411_vm6, %v1236_v30  ;;  %1249 = vst.msk [vmem:[#allocation12] sm:$0x3] %vm411_vm6, %v1247_v43 }
 0xfe2   :  { %1539 = shalt.err (!%p1536_p0)
}
 0xfe3   :  { %s1540_s1 = scalar_lea.hbm %s2109_s6, 256 }
 0xfe4   :  { %p1541_p1 = scmp.ne.s32.totalorder %s2109_s6, %s1540_s1  ;;  %p1544_p2 = scmp.lt.u32.totalorder %s1540_s1, %s2109_s6 }
 0xfe6   :  { %p1546_p3 = pnand %p1544_p2, %p1541_p1 }
 0xfe8   :  { %1549 = shalt.err (!%p1546_p3)
}
 0xfe9   :  { %s1591_s30 = smov 2   ;;  %s1550_s10 = scalar_lea.vmem %s2064_s21, 256 }
 0xfea   :  { %1261 = dma.vmem_to_hbm [thread:$0]  %s1256_s19, 256, %s2109_s6, [#allocation7], %s1588_s3, %s1588_s3, %s1591_s30  }
 0xfeb   :  { %p1551_p4 = scmp.ne.s32.totalorder %s2064_s21, %s1550_s10  ;;  %p1555_p5 = scmp.lt.s32.totalorder %s2064_s21, %s2064_s21 }
 0xfec   :  { %p1556_p6 = scmp.lt.s32.totalorder %s1550_s10, %s1550_s10 }
 0xfee   :  { %p1557_p7 = por %p1556_p6, %p1555_p5 }
 0xff0   :  { %p1558_p8 = pnand %p1557_p7, %p1551_p4 }
 0xff2   :  { %1561 = shalt.err (!%p1558_p8)
}
 0xff3   :  { %s1562_s15 = scalar_lea.hbm %s2110_s7, 256 }
 0xff4   :  { %p1563_p9 = scmp.ne.s32.totalorder %s2110_s7, %s1562_s15  ;;  %p1566_p10 = scmp.lt.u32.totalorder %s1562_s15, %s2110_s7 }
 0xff6   :  { %p1568_p11 = pnand %p1566_p10, %p1563_p9 }
 0xff8   :  { %1571 = shalt.err (!%p1568_p11)
}
 0xff9   :  { %1273 = dma.vmem_to_hbm [thread:$0]  %s2064_s21, 256, %s2110_s7, [#allocation13], %s1588_s3, %s1588_s3, %s1591_s30   ;;  %v1241_v44 = vpop.permute.xlu1 %1240 }
 0xffa   :  { %1243 = vst.msk [vmem:[#allocation4] sm:$0x3] %vm254_vm1, %v1241_v44 }
 0xffb   :  { %1576 = dma.done.wait [#allocation7], 256  }
 0xffc   :  { %1577 = vsyncadd [#allocation7], 4294967040 }
 0xffd   :  { %1578 = dma.done.wait [#allocation13], 256  }
 0xffe   :  { %1579 = vsyncadd [#allocation13], 4294967040 }
 0xfff   :  { %1280 = vsyncpa [#allocation6], 1 }
0x1000   :  { %1281 = vsyncpa [#allocation9], 1 }
0x1001   :  { %1282 = vsyncpa [#allocation7], 1 }
0x1002   :  { %1283 = vsyncpa [#allocation13], 1 }

</bundles_post_ra>
